<compile_context>
chip_gen: v5e
topology: v5e:2x2
jax: 0.10.0
libtpu: 0.0.40
codegen_flags: <defaults>
</compile_context>

<pallas_src>
import math
from functools import partial

import jax
import jax.numpy as jnp
from jax.experimental import pallas as pl
from jax.experimental.pallas import tpu as pltpu  # noqa: F401

# ----------------------------- config ---------------------------------------
HIDDEN = 32
NUM_HEADS = 4
HEAD_DIM = HIDDEN // NUM_HEADS
INTERMEDIATE = 64
NUM_LAYERS = 2
MAX_POS = 64
LN_EPS = 1e-12
IN_CHANNELS = 16
MODEL_CHANNELS = 8
OUT_CHANNELS = 3
TIME_EMBED_DIM = MODEL_CHANNELS * 4
GELU_C = 0.7978845608028654  # sqrt(2/pi)
SLAB_WIDTH = 3 * HIDDEN      # 96 lanes: widest packed row (fused QKV)

# ---- packed-slab row offsets (all multiples of 8 -> aligned sublane slices) --
# bias / LayerNorm vector slab: [N_VEC_ROWS, SLAB_WIDTH]
V_T1B, V_T2B, V_UPB, V_LNG, V_LNB, V_H1B, V_H2B = range(7)
V_LAYER0 = 7
V_PER_LAYER = 8            # qkvb, aob, ln1_g, ln1_b, ib, ob, ln2_g, ln2_b
N_VEC_ROWS = V_LAYER0 + NUM_LAYERS * V_PER_LAYER           # 23

# weight-matrix slab: [N_W_ROWS, SLAB_WIDTH]
R_T1W = 0                                  # [MC, TED]        8 rows
R_T2W = R_T1W + MODEL_CHANNELS             # [TED, H]         32 rows  (off 8)
R_UPW = R_T2W + TIME_EMBED_DIM             # [IN, H]          16 rows  (off 40)
R_H1W = R_UPW + IN_CHANNELS                # [H, H]           32 rows  (off 56)
R_H2W = R_H1W + HIDDEN                     # [H, OUT]         32 rows  (off 88)
R_POS = R_H2W + HIDDEN                     # [MAX_POS, H]     64 rows  (off 120)
R_LAYER0 = R_POS + MAX_POS                 # per-layer blocks start (off 184)
R_PER_LAYER = 3 * HIDDEN + INTERMEDIATE    # qkvw(32)+aow(32)+iw(32)+ow(64) = 160
W_QKV, W_AO, W_I, W_O = 0, HIDDEN, 2 * HIDDEN, 3 * HIDDEN
N_W_ROWS = R_LAYER0 + NUM_LAYERS * R_PER_LAYER              # 504


# ----------------------------- in-kernel helpers -----------------------------
def _layernorm(x, g, b, eps=LN_EPS):
    mean = jnp.mean(x, axis=-1, keepdims=True)
    var = jnp.mean((x - mean) ** 2, axis=-1, keepdims=True)
    return (x - mean) * jax.lax.rsqrt(var + eps) * g + b


def _gelu_tanh(y):  # HF "gelu_new"
    return 0.5 * y * (1.0 + jnp.tanh(GELU_C * (y + 0.044715 * y * y * y)))


# ----------------------------- fused Pallas kernel ---------------------------
def _fused_forward_kernel(t_ref, x_ref, mask_ref, vec_ref, w_ref, out_ref,
                          *, batch, seq, num_layers):
    H, nH, dH, INTER = HIDDEN, NUM_HEADS, HEAD_DIM, INTERMEDIATE
    BS = batch * seq
    scale = 1.0 / math.sqrt(dH)

    def vrow(i, n):                       # [1, n] bias / LN row (static slice)
        return vec_ref[i:i + 1, :n]

    # ---- time embedding MLP: Linear -> SiLU -> Linear ------------------------
    t = t_ref[...]                                                     # [B, MC]
    ht = jnp.dot(t, w_ref[R_T1W:R_T1W + MODEL_CHANNELS, :TIME_EMBED_DIM],
                 preferred_element_type=jnp.float32) + vrow(V_T1B, TIME_EMBED_DIM)
    ht = ht * jax.nn.sigmoid(ht)
    emb = jnp.dot(ht, w_ref[R_T2W:R_T2W + TIME_EMBED_DIM, :H],
                  preferred_element_type=jnp.float32) + vrow(V_T2B, H)  # [B, H]

    # ---- tiny batch-structure matrices built in-kernel (iota/compare, no div)
    ii = jax.lax.broadcasted_iota(jnp.int32, (BS, batch), 0)
    bb = jax.lax.broadcasted_iota(jnp.int32, (BS, batch), 1) * seq
    expand = jnp.logical_and(ii >= bb, ii < bb + seq).astype(jnp.float32)      # [BS, B]
    jj = jax.lax.broadcasted_iota(jnp.int32, (batch, BS), 1)
    bb2 = jax.lax.broadcasted_iota(jnp.int32, (batch, BS), 0) * seq
    expand_t = jnp.logical_and(jj >= bb2, jj < bb2 + seq).astype(jnp.float32)  # [B, BS]
    same = jnp.dot(expand, expand_t, preferred_element_type=jnp.float32)       # [BS, BS]

    # ---- input up-projection + position + broadcast time emb + LayerNorm ----
    x2 = x_ref[...]                                                    # [BS, IN]
    emb_x = jnp.dot(x2, w_ref[R_UPW:R_UPW + IN_CHANNELS, :H],
                    preferred_element_type=jnp.float32) + vrow(V_UPB, H)
    emb_b = jnp.dot(expand, emb, preferred_element_type=jnp.float32)   # [BS, H]
    pos_s = w_ref[R_POS:R_POS + seq, :H]                               # [S, H]
    pos_t = jnp.concatenate([pos_s] * batch, axis=0)                   # [BS, H]
    h = _layernorm(pos_t + emb_x + emb_b, vrow(V_LNG, H), vrow(V_LNB, H))
    # dropout: identity (eval mode)

    # ---- additive attention bias: raw 0/1 mask within batch (matches the spec,
    # which adds attn_mask[:,None,None,:] directly), -1e9 across batches -------
    mask_b = jnp.broadcast_to(mask_ref[...], (BS, BS))                 # [BS, BS]
    bias = jnp.where(same > 0.5, mask_b, -1e9)

    # ---- BERT encoder layers (statically unrolled) ---------------------------
    for l in range(num_layers):
        wb = R_LAYER0 + l * R_PER_LAYER
        vb = V_LAYER0 + l * V_PER_LAYER

        # fused QKV projection: one [BS, 3H] matmul
        qkv = jnp.dot(h, w_ref[wb + W_QKV:wb + W_QKV + H, :3 * H],
                      preferred_element_type=jnp.float32) + vrow(vb + 0, 3 * H)

        attn = jnp.zeros((BS, H), jnp.float32)
        for hd in range(nH):
            qh = qkv[:, hd * dH:(hd + 1) * dH]
            kh = qkv[:, H + hd * dH:H + (hd + 1) * dH]
            vh = qkv[:, 2 * H + hd * dH:2 * H + (hd + 1) * dH]
            # scores over the full [BS, BS] (transpose folded into operand feed)
            s = jax.lax.dot_general(qh, kh, (((1,), (1,)), ((), ())),
                                    preferred_element_type=jnp.float32) * scale + bias
            s = s - jnp.max(s, axis=-1, keepdims=True)
            p = jnp.exp(s)
            p = p * pl.reciprocal(jnp.sum(p, axis=-1, keepdims=True), approx=True)
            ctx_h = jnp.dot(p, vh, preferred_element_type=jnp.float32)          # [BS, dH]
            # output projection folded in per head (no lane concat)
            attn = attn + jnp.dot(
                ctx_h, w_ref[wb + W_AO + hd * dH:wb + W_AO + (hd + 1) * dH, :H],
                preferred_element_type=jnp.float32)
        attn = attn + vrow(vb + 1, H)
        h = _layernorm(attn + h, vrow(vb + 2, H), vrow(vb + 3, H))

        # FFN: Linear -> gelu_new -> Linear, + residual + LN2
        inter = _gelu_tanh(jnp.dot(h, w_ref[wb + W_I:wb + W_I + H, :INTER],
                                   preferred_element_type=jnp.float32) + vrow(vb + 4, INTER))
        ffn = jnp.dot(inter, w_ref[wb + W_O:wb + W_O + INTER, :H],
                      preferred_element_type=jnp.float32) + vrow(vb + 5, H)
        h = _layernorm(ffn + h, vrow(vb + 6, H), vrow(vb + 7, H))

    # ---- mean pool + regression head (stop_grad / dropout are identities) ----
    pooled = jnp.dot(expand_t * (1.0 / seq), h,
                     preferred_element_type=jnp.float32)               # [B, H]
    z = jnp.tanh(jnp.dot(pooled, w_ref[R_H1W:R_H1W + H, :H],
                         preferred_element_type=jnp.float32) + vrow(V_H1B, H))
    out = jnp.dot(z, w_ref[R_H2W:R_H2W + H, :OUT_CHANNELS],
                  preferred_element_type=jnp.float32) + vrow(V_H2B, OUT_CHANNELS)
    out_ref[...] = out.astype(out_ref.dtype)


# ----------------------------- glue (plain JAX) -------------------------------
def timestep_embedding(timesteps, dim, max_period=10000):
    half = dim // 2
    freqs = jnp.exp(-math.log(max_period) * jnp.arange(half, dtype=jnp.float32) / half)
    args = timesteps[:, None].astype(jnp.float32) * freqs[None]
    emb = jnp.concatenate([jnp.cos(args), jnp.sin(args)], axis=-1)
    if dim % 2:
        emb = jnp.concatenate([emb, jnp.zeros_like(emb[:, :1])], axis=-1)
    return emb


def init_params(key):
    keys = iter(jax.random.split(key, 64))

    def dense(fan_in, fan_out):
        w = jax.random.normal(next(keys), (fan_in, fan_out), jnp.float32) * 0.02
        b = jax.random.normal(next(keys), (fan_out,), jnp.float32) * 0.02
        return {"w": w, "b": b}

    params = {
        "time1": dense(MODEL_CHANNELS, TIME_EMBED_DIM),
        "time2": dense(TIME_EMBED_DIM, HIDDEN),
        "up": dense(IN_CHANNELS, HIDDEN),
        "pos_emb": jax.random.normal(next(keys), (MAX_POS, HIDDEN), jnp.float32) * 0.02,
        "ln_g": jnp.ones((HIDDEN,), jnp.float32),
        "ln_b": jnp.zeros((HIDDEN,), jnp.float32),
        "head1": dense(HIDDEN, HIDDEN),
        "head2": dense(HIDDEN, OUT_CHANNELS),
        "layers": [],
    }
    for _ in range(NUM_LAYERS):
        params["layers"].append({
            "q": dense(HIDDEN, HIDDEN),
            "k": dense(HIDDEN, HIDDEN),
            "v": dense(HIDDEN, HIDDEN),
            "ao": dense(HIDDEN, HIDDEN),
            "ln1_g": jnp.ones((HIDDEN,), jnp.float32),
            "ln1_b": jnp.zeros((HIDDEN,), jnp.float32),
            "i": dense(HIDDEN, INTERMEDIATE),
            "o": dense(INTERMEDIATE, HIDDEN),
            "ln2_g": jnp.ones((HIDDEN,), jnp.float32),
            "ln2_b": jnp.zeros((HIDDEN,), jnp.float32),
        })
    return params


def _pad_row(v):
    v = jnp.asarray(v, jnp.float32).reshape(-1)
    return jnp.pad(v, (0, SLAB_WIDTH - v.shape[0]))[None, :]


def _pad_mat(w):
    w = jnp.asarray(w, jnp.float32)
    return jnp.pad(w, ((0, 0), (0, SLAB_WIDTH - w.shape[1])))


def pack_params(p):
    """Pack every weight matrix into one [504,96] slab and every bias / LN
    vector into one [23,96] slab (static, sublane-aligned row offsets), so the
    kernel issues 2 weight DMAs per call instead of ~30."""
    L = p["layers"]

    wrows = [
        _pad_mat(p["time1"]["w"]),        # R_T1W
        _pad_mat(p["time2"]["w"]),        # R_T2W
        _pad_mat(p["up"]["w"]),           # R_UPW
        _pad_mat(p["head1"]["w"]),        # R_H1W
        _pad_mat(p["head2"]["w"]),        # R_H2W
        _pad_mat(p["pos_emb"]),           # R_POS
    ]
    for l in L:
        qkvw = jnp.concatenate([l["q"]["w"], l["k"]["w"], l["v"]["w"]], axis=1)
        wrows += [_pad_mat(qkvw), _pad_mat(l["ao"]["w"]),
                  _pad_mat(l["i"]["w"]), _pad_mat(l["o"]["w"])]
    wmats = jnp.concatenate(wrows, axis=0)
    assert wmats.shape == (N_W_ROWS, SLAB_WIDTH), wmats.shape

    vrows = [_pad_row(p["time1"]["b"]), _pad_row(p["time2"]["b"]),
             _pad_row(p["up"]["b"]), _pad_row(p["ln_g"]), _pad_row(p["ln_b"]),
             _pad_row(p["head1"]["b"]), _pad_row(p["head2"]["b"])]
    for l in L:
        qkvb = jnp.concatenate([l["q"]["b"], l["k"]["b"], l["v"]["b"]])
        vrows += [_pad_row(qkvb), _pad_row(l["ao"]["b"]),
                  _pad_row(l["ln1_g"]), _pad_row(l["ln1_b"]),
                  _pad_row(l["i"]["b"]), _pad_row(l["o"]["b"]),
                  _pad_row(l["ln2_g"]), _pad_row(l["ln2_b"])]
    vecs = jnp.concatenate(vrows, axis=0)
    assert vecs.shape == (N_VEC_ROWS, SLAB_WIDTH), vecs.shape

    return {"vecs": vecs, "wmats": wmats}


@jax.jit
def regression_model_forward(packed, sequence_embeds, timesteps, attn_mask=None):
    B, S, _ = sequence_embeds.shape
    x = jax.lax.stop_gradient(sequence_embeds)                   # stop_grad=True
    t_feats = timestep_embedding(timesteps, MODEL_CHANNELS)      # [B, model_channels]
    if attn_mask is None:
        attn_mask = jnp.ones((B, S), jnp.float32)                # ones_like(seq[..., 0])
    mask_flat = attn_mask.astype(jnp.float32).reshape(1, B * S)

    kernel = partial(_fused_forward_kernel, batch=B, seq=S, num_layers=NUM_LAYERS)
    return pl.pallas_call(
        kernel,
        out_shape=jax.ShapeDtypeStruct((B, OUT_CHANNELS), jnp.float32),
        cost_estimate=pl.CostEstimate(flops=620_000, transcendentals=4_500,
                                      bytes_accessed=270_000),
    )(
        t_feats,
        x.reshape(B * S, IN_CHANNELS),
        mask_flat,
        packed["vecs"],
        packed["wmats"],
    )


# ----------------------------- pure-JAX reference ----------------------------
def _reference_forward(params, sequence_embeds, timesteps, attn_mask=None):
    B, S, _ = sequence_embeds.shape
    hp = jax.lax.Precision.HIGHEST
    lin = lambda x, p: jnp.dot(x, p["w"], precision=hp) + p["b"]

    def lnorm(x, g, b):
        m = jnp.mean(x, -1, keepdims=True)
        v = jnp.mean((x - m) ** 2, -1, keepdims=True)
        return (x - m) * jax.lax.rsqrt(v + LN_EPS) * g + b

    t_feats = timestep_embedding(timesteps, MODEL_CHANNELS)
    ht = lin(t_feats, params["time1"]); ht = ht * jax.nn.sigmoid(ht)
    emb = lin(ht, params["time2"])
    emb_x = lin(sequence_embeds, params["up"])
    h = params["pos_emb"][:S][None] + emb_x + emb[:, None, :]
    h = lnorm(h, params["ln_g"], params["ln_b"])
    if attn_mask is None:
        attn_mask = jnp.ones((B, S), jnp.float32)
    add_mask = attn_mask[:, None, None, :]
    for lp in params["layers"]:
        sh = lambda y: y.reshape(B, S, NUM_HEADS, HEAD_DIM).transpose(0, 2, 1, 3)
        q, k, v = sh(lin(h, lp["q"])), sh(lin(h, lp["k"])), sh(lin(h, lp["v"]))
        s = jnp.einsum("bhqd,bhkd->bhqk", q, k, precision=hp) / math.sqrt(HEAD_DIM) + add_mask
        p = jax.nn.softmax(s, axis=-1)
        ctx = jnp.einsum("bhqk,bhkd->bhqd", p, v, precision=hp).transpose(0, 2, 1, 3).reshape(B, S, HIDDEN)
        h = lnorm(lin(ctx, lp["ao"]) + h, lp["ln1_g"], lp["ln1_b"])
        inter = lin(h, lp["i"])
        inter = 0.5 * inter * (1.0 + jnp.tanh(GELU_C * (inter + 0.044715 * inter ** 3)))
        h = lnorm(lin(inter, lp["o"]) + h, lp["ln2_g"], lp["ln2_b"])
    pooled = h.mean(axis=1)
    z = jnp.tanh(lin(pooled, params["head1"]))
    return lin(z, params["head2"])


# ----------------------------- main ------------------------------------------
if __name__ == "__main__":
    key = jax.random.PRNGKey(0)
    k_param, k_x, k_t = jax.random.split(key, 3)

    B, S = 2, 8
    params = init_params(k_param)
    packed = pack_params(params)
    sequence_embeds = jax.random.normal(k_x, (B, S, IN_CHANNELS), jnp.float32)
    timesteps = jax.random.uniform(k_t, (B,), jnp.float32, 0.0, 1000.0)

    out = regression_model_forward(packed, sequence_embeds, timesteps)
    jax.block_until_ready(out)
    assert out.shape == (B, OUT_CHANNELS)

    ref = _reference_forward(params, sequence_embeds, timesteps)
    assert jnp.allclose(out, ref, atol=1e-2, rtol=1e-2), (out, ref)

    print("KERNEL_OK")
</pallas_src>

<mosaic_0001>
module attributes {stable_mosaic.version = 11 : i64} {
  func.func @_fused_forward_kernel(%arg0: memref<2x8xf32, #tpu.memory_space<vmem>>, %arg1: memref<16x16xf32, #tpu.memory_space<vmem>>, %arg2: memref<1x16xf32, #tpu.memory_space<vmem>>, %arg3: memref<23x96xf32, #tpu.memory_space<vmem>>, %arg4: memref<504x96xf32, #tpu.memory_space<vmem>>, %arg5: memref<2x3xf32, #tpu.memory_space<vmem>>) attributes {dimension_semantics = [], scalar_prefetch = 0 : i64, scratch_operands = 0 : i64, tpu.core_type = #tpu.core_type<tc>} {
    %c0 = arith.constant 0 : index
    %c0_0 = arith.constant 0 : index
    %0 = vector.load %arg0[%c0, %c0_0] : memref<2x8xf32, #tpu.memory_space<vmem>>, vector<2x8xf32>
    %c0_1 = arith.constant 0 : index
    %c0_2 = arith.constant 0 : index
    %1 = vector.load %arg4[%c0_1, %c0_2] : memref<504x96xf32, #tpu.memory_space<vmem>>, vector<8x32xf32>
    %cst = arith.constant dense<0.000000e+00> : vector<2x32xf32>
    %2 = tpu.matmul %0, %1, %cst {dimension_numbers = #tpu.dot_dimension_numbers<[1], [0], [0], [1], [0, 0, 1, 1], [], []>} : vector<2x8xf32>, vector<8x32xf32>, vector<2x32xf32> -> vector<2x32xf32>
    %c0_3 = arith.constant 0 : index
    %c0_4 = arith.constant 0 : index
    %3 = vector.load %arg3[%c0_3, %c0_4] : memref<23x96xf32, #tpu.memory_space<vmem>>, vector<1x32xf32>
    %4 = vector.broadcast %3 : vector<1x32xf32> to vector<2x32xf32>
    %5 = arith.addf %2, %4 : vector<2x32xf32>
    %6 = arith.negf %5 : vector<2x32xf32>
    %7 = math.exp %6 : vector<2x32xf32>
    %cst_5 = arith.constant 1.000000e+00 : f32
    %8 = vector.broadcast %cst_5 : f32 to vector<2x32xf32>
    %9 = arith.addf %8, %7 : vector<2x32xf32>
    %10 = arith.divf %8, %9 : vector<2x32xf32>
    %11 = arith.mulf %5, %10 : vector<2x32xf32>
    %c8 = arith.constant 8 : index
    %c0_6 = arith.constant 0 : index
    %12 = vector.load %arg4[%c8, %c0_6] : memref<504x96xf32, #tpu.memory_space<vmem>>, vector<32x32xf32>
    %cst_7 = arith.constant dense<0.000000e+00> : vector<2x32xf32>
    %13 = tpu.matmul %11, %12, %cst_7 {dimension_numbers = #tpu.dot_dimension_numbers<[1], [0], [0], [1], [0, 0, 1, 1], [], []>} : vector<2x32xf32>, vector<32x32xf32>, vector<2x32xf32> -> vector<2x32xf32>
    %c1 = arith.constant 1 : index
    %c0_8 = arith.constant 0 : index
    %14 = vector.load %arg3[%c1, %c0_8] : memref<23x96xf32, #tpu.memory_space<vmem>>, vector<1x32xf32>
    %15 = vector.broadcast %14 : vector<1x32xf32> to vector<2x32xf32>
    %16 = arith.addf %13, %15 : vector<2x32xf32>
    %17 = tpu.iota {dimensions = array<i32: 0>} : vector<16x2xi32>
    %18 = tpu.iota {dimensions = array<i32: 1>} : vector<16x2xi32>
    %c8_i32 = arith.constant 8 : i32
    %19 = vector.broadcast %c8_i32 : i32 to vector<16x2xi32>
    %20 = arith.muli %18, %19 : vector<16x2xi32>
    %21 = arith.cmpi sge, %17, %20 : vector<16x2xi32>
    %c8_i32_9 = arith.constant 8 : i32
    %22 = vector.broadcast %c8_i32_9 : i32 to vector<16x2xi32>
    %23 = arith.addi %20, %22 : vector<16x2xi32>
    %24 = arith.cmpi slt, %17, %23 : vector<16x2xi32>
    %25 = arith.andi %21, %24 : vector<16x2xi1>
    %26 = arith.extui %25 : vector<16x2xi1> to vector<16x2xi32>
    %27 = arith.sitofp %26 : vector<16x2xi32> to vector<16x2xf32>
    %28 = tpu.iota {dimensions = array<i32: 1>} : vector<2x16xi32>
    %29 = tpu.iota {dimensions = array<i32: 0>} : vector<2x16xi32>
    %c8_i32_10 = arith.constant 8 : i32
    %30 = vector.broadcast %c8_i32_10 : i32 to vector<2x16xi32>
    %31 = arith.muli %29, %30 : vector<2x16xi32>
    %32 = arith.cmpi sge, %28, %31 : vector<2x16xi32>
    %c8_i32_11 = arith.constant 8 : i32
    %33 = vector.broadcast %c8_i32_11 : i32 to vector<2x16xi32>
    %34 = arith.addi %31, %33 : vector<2x16xi32>
    %35 = arith.cmpi slt, %28, %34 : vector<2x16xi32>
    %36 = arith.andi %32, %35 : vector<2x16xi1>
    %37 = arith.extui %36 : vector<2x16xi1> to vector<2x16xi32>
    %38 = arith.sitofp %37 : vector<2x16xi32> to vector<2x16xf32>
    %cst_12 = arith.constant dense<0.000000e+00> : vector<16x16xf32>
    %39 = tpu.matmul %27, %38, %cst_12 {dimension_numbers = #tpu.dot_dimension_numbers<[1], [0], [0], [1], [0, 0, 1, 1], [], []>} : vector<16x2xf32>, vector<2x16xf32>, vector<16x16xf32> -> vector<16x16xf32>
    %c0_13 = arith.constant 0 : index
    %c0_14 = arith.constant 0 : index
    %40 = vector.load %arg1[%c0_13, %c0_14] : memref<16x16xf32, #tpu.memory_space<vmem>>, vector<16x16xf32>
    %c40 = arith.constant 40 : index
    %c0_15 = arith.constant 0 : index
    %41 = vector.load %arg4[%c40, %c0_15] : memref<504x96xf32, #tpu.memory_space<vmem>>, vector<16x32xf32>
    %cst_16 = arith.constant dense<0.000000e+00> : vector<16x32xf32>
    %42 = tpu.matmul %40, %41, %cst_16 {dimension_numbers = #tpu.dot_dimension_numbers<[1], [0], [0], [1], [0, 0, 1, 1], [], []>} : vector<16x16xf32>, vector<16x32xf32>, vector<16x32xf32> -> vector<16x32xf32>
    %c2 = arith.constant 2 : index
    %c0_17 = arith.constant 0 : index
    %43 = vector.load %arg3[%c2, %c0_17] : memref<23x96xf32, #tpu.memory_space<vmem>>, vector<1x32xf32>
    %44 = vector.broadcast %43 : vector<1x32xf32> to vector<16x32xf32>
    %45 = arith.addf %42, %44 : vector<16x32xf32>
    %cst_18 = arith.constant dense<0.000000e+00> : vector<16x32xf32>
    %46 = tpu.matmul %27, %16, %cst_18 {dimension_numbers = #tpu.dot_dimension_numbers<[1], [0], [0], [1], [0, 0, 1, 1], [], []>} : vector<16x2xf32>, vector<2x32xf32>, vector<16x32xf32> -> vector<16x32xf32>
    %c120 = arith.constant 120 : index
    %c0_19 = arith.constant 0 : index
    %47 = vector.load %arg4[%c120, %c0_19] : memref<504x96xf32, #tpu.memory_space<vmem>>, vector<8x32xf32>
    %48 = tpu.concatenate %47, %47 in 0 : vector<8x32xf32>, vector<8x32xf32> -> vector<16x32xf32>
    %49 = arith.addf %48, %45 : vector<16x32xf32>
    %50 = arith.addf %49, %46 : vector<16x32xf32>
    %c3 = arith.constant 3 : index
    %c0_20 = arith.constant 0 : index
    %51 = vector.load %arg3[%c3, %c0_20] : memref<23x96xf32, #tpu.memory_space<vmem>>, vector<1x32xf32>
    %c4 = arith.constant 4 : index
    %c0_21 = arith.constant 0 : index
    %52 = vector.load %arg3[%c4, %c0_21] : memref<23x96xf32, #tpu.memory_space<vmem>>, vector<1x32xf32>
    %cst_22 = arith.constant dense<0.000000e+00> : vector<16xf32>
    %53 = vector.multi_reduction <add>, %50, %cst_22 [1] : vector<16x32xf32> to vector<16xf32>
    %54 = vector.shape_cast %53 : vector<16xf32> to vector<16x1xf32>
    %cst_23 = arith.constant 3.200000e+01 : f32
    %55 = vector.broadcast %cst_23 : f32 to vector<16x1xf32>
    %56 = arith.divf %54, %55 : vector<16x1xf32>
    %57 = vector.broadcast %56 : vector<16x1xf32> to vector<16x32xf32>
    %58 = arith.subf %50, %57 : vector<16x32xf32>
    %59 = arith.mulf %58, %58 : vector<16x32xf32>
    %cst_24 = arith.constant dense<0.000000e+00> : vector<16xf32>
    %60 = vector.multi_reduction <add>, %59, %cst_24 [1] : vector<16x32xf32> to vector<16xf32>
    %61 = vector.shape_cast %60 : vector<16xf32> to vector<16x1xf32>
    %cst_25 = arith.constant 3.200000e+01 : f32
    %62 = vector.broadcast %cst_25 : f32 to vector<16x1xf32>
    %63 = arith.divf %61, %62 : vector<16x1xf32>
    %64 = vector.broadcast %56 : vector<16x1xf32> to vector<16x32xf32>
    %65 = arith.subf %50, %64 : vector<16x32xf32>
    %cst_26 = arith.constant 9.99999996E-13 : f32
    %66 = vector.broadcast %cst_26 : f32 to vector<16x1xf32>
    %67 = arith.addf %63, %66 : vector<16x1xf32>
    %68 = math.rsqrt %67 : vector<16x1xf32>
    %69 = vector.broadcast %68 : vector<16x1xf32> to vector<16x32xf32>
    %70 = arith.mulf %65, %69 : vector<16x32xf32>
    %71 = vector.broadcast %51 : vector<1x32xf32> to vector<16x32xf32>
    %72 = arith.mulf %70, %71 : vector<16x32xf32>
    %73 = vector.broadcast %52 : vector<1x32xf32> to vector<16x32xf32>
    %74 = arith.addf %72, %73 : vector<16x32xf32>
    %c0_27 = arith.constant 0 : index
    %c0_28 = arith.constant 0 : index
    %75 = vector.load %arg2[%c0_27, %c0_28] : memref<1x16xf32, #tpu.memory_space<vmem>>, vector<1x16xf32>
    %76 = vector.shape_cast %75 : vector<1x16xf32> to vector<1x16xf32>
    %77 = vector.broadcast %76 : vector<1x16xf32> to vector<16x16xf32>
    %cst_29 = arith.constant 5.000000e-01 : f32
    %78 = vector.broadcast %cst_29 : f32 to vector<16x16xf32>
    %79 = arith.cmpf ogt, %39, %78 : vector<16x16xf32>
    %cst_30 = arith.constant -1.000000e+09 : f32
    %80 = vector.broadcast %cst_30 : f32 to vector<16x16xf32>
    %81 = arith.select %79, %77, %80 : vector<16x16xi1>, vector<16x16xf32>
    %c184 = arith.constant 184 : index
    %c0_31 = arith.constant 0 : index
    %82 = vector.load %arg4[%c184, %c0_31] : memref<504x96xf32, #tpu.memory_space<vmem>>, vector<32x96xf32>
    %cst_32 = arith.constant dense<0.000000e+00> : vector<16x96xf32>
    %83 = tpu.matmul %74, %82, %cst_32 {dimension_numbers = #tpu.dot_dimension_numbers<[1], [0], [0], [1], [0, 0, 1, 1], [], []>} : vector<16x32xf32>, vector<32x96xf32>, vector<16x96xf32> -> vector<16x96xf32>
    %c7 = arith.constant 7 : index
    %c0_33 = arith.constant 0 : index
    %84 = vector.load %arg3[%c7, %c0_33] : memref<23x96xf32, #tpu.memory_space<vmem>>, vector<1x96xf32>
    %85 = vector.broadcast %84 : vector<1x96xf32> to vector<16x96xf32>
    %86 = arith.addf %83, %85 : vector<16x96xf32>
    %cst_34 = arith.constant 0.000000e+00 : f32
    %87 = vector.broadcast %cst_34 : f32 to vector<16x32xf32>
    %88 = vector.extract_strided_slice %86 {offsets = [0, 0], sizes = [16, 8], strides = [1, 1]} : vector<16x96xf32> to vector<16x8xf32>
    %89 = vector.extract_strided_slice %86 {offsets = [0, 32], sizes = [16, 8], strides = [1, 1]} : vector<16x96xf32> to vector<16x8xf32>
    %90 = vector.extract_strided_slice %86 {offsets = [0, 64], sizes = [16, 8], strides = [1, 1]} : vector<16x96xf32> to vector<16x8xf32>
    %cst_35 = arith.constant dense<0.000000e+00> : vector<16x16xf32>
    %91 = tpu.matmul %88, %89, %cst_35 {dimension_numbers = #tpu.dot_dimension_numbers<[1], [1], [0], [0], [0, 0, 1, 0], [], []>} : vector<16x8xf32>, vector<16x8xf32>, vector<16x16xf32> -> vector<16x16xf32>
    %cst_36 = arith.constant 0.353553385 : f32
    %92 = vector.broadcast %cst_36 : f32 to vector<16x16xf32>
    %93 = arith.mulf %91, %92 : vector<16x16xf32>
    %94 = arith.addf %93, %81 : vector<16x16xf32>
    %cst_37 = arith.constant dense<0xFF800000> : vector<16xf32>
    %95 = vector.multi_reduction <maximumf>, %94, %cst_37 [1] : vector<16x16xf32> to vector<16xf32>
    %96 = vector.shape_cast %95 : vector<16xf32> to vector<16x1xf32>
    %97 = vector.broadcast %96 : vector<16x1xf32> to vector<16x16xf32>
    %98 = arith.subf %94, %97 : vector<16x16xf32>
    %99 = math.exp %98 : vector<16x16xf32>
    %cst_38 = arith.constant dense<0.000000e+00> : vector<16xf32>
    %100 = vector.multi_reduction <add>, %99, %cst_38 [1] : vector<16x16xf32> to vector<16xf32>
    %101 = vector.shape_cast %100 : vector<16xf32> to vector<16x1xf32>
    %102 = tpu.reciprocal %101 {approx = true} : vector<16x1xf32> -> vector<16x1xf32>
    %103 = vector.broadcast %102 : vector<16x1xf32> to vector<16x16xf32>
    %104 = arith.mulf %99, %103 : vector<16x16xf32>
    %cst_39 = arith.constant dense<0.000000e+00> : vector<16x8xf32>
    %105 = tpu.matmul %104, %90, %cst_39 {dimension_numbers = #tpu.dot_dimension_numbers<[1], [0], [0], [1], [0, 0, 1, 1], [], []>} : vector<16x16xf32>, vector<16x8xf32>, vector<16x8xf32> -> vector<16x8xf32>
    %c216 = arith.constant 216 : index
    %c0_40 = arith.constant 0 : index
    %106 = vector.load %arg4[%c216, %c0_40] : memref<504x96xf32, #tpu.memory_space<vmem>>, vector<8x32xf32>
    %cst_41 = arith.constant dense<0.000000e+00> : vector<16x32xf32>
    %107 = tpu.matmul %105, %106, %cst_41 {dimension_numbers = #tpu.dot_dimension_numbers<[1], [0], [0], [1], [0, 0, 1, 1], [], []>} : vector<16x8xf32>, vector<8x32xf32>, vector<16x32xf32> -> vector<16x32xf32>
    %108 = arith.addf %87, %107 : vector<16x32xf32>
    %109 = vector.extract_strided_slice %86 {offsets = [0, 8], sizes = [16, 8], strides = [1, 1]} : vector<16x96xf32> to vector<16x8xf32>
    %110 = vector.extract_strided_slice %86 {offsets = [0, 40], sizes = [16, 8], strides = [1, 1]} : vector<16x96xf32> to vector<16x8xf32>
    %111 = vector.extract_strided_slice %86 {offsets = [0, 72], sizes = [16, 8], strides = [1, 1]} : vector<16x96xf32> to vector<16x8xf32>
    %cst_42 = arith.constant dense<0.000000e+00> : vector<16x16xf32>
    %112 = tpu.matmul %109, %110, %cst_42 {dimension_numbers = #tpu.dot_dimension_numbers<[1], [1], [0], [0], [0, 0, 1, 0], [], []>} : vector<16x8xf32>, vector<16x8xf32>, vector<16x16xf32> -> vector<16x16xf32>
    %cst_43 = arith.constant 0.353553385 : f32
    %113 = vector.broadcast %cst_43 : f32 to vector<16x16xf32>
    %114 = arith.mulf %112, %113 : vector<16x16xf32>
    %115 = arith.addf %114, %81 : vector<16x16xf32>
    %cst_44 = arith.constant dense<0xFF800000> : vector<16xf32>
    %116 = vector.multi_reduction <maximumf>, %115, %cst_44 [1] : vector<16x16xf32> to vector<16xf32>
    %117 = vector.shape_cast %116 : vector<16xf32> to vector<16x1xf32>
    %118 = vector.broadcast %117 : vector<16x1xf32> to vector<16x16xf32>
    %119 = arith.subf %115, %118 : vector<16x16xf32>
    %120 = math.exp %119 : vector<16x16xf32>
    %cst_45 = arith.constant dense<0.000000e+00> : vector<16xf32>
    %121 = vector.multi_reduction <add>, %120, %cst_45 [1] : vector<16x16xf32> to vector<16xf32>
    %122 = vector.shape_cast %121 : vector<16xf32> to vector<16x1xf32>
    %123 = tpu.reciprocal %122 {approx = true} : vector<16x1xf32> -> vector<16x1xf32>
    %124 = vector.broadcast %123 : vector<16x1xf32> to vector<16x16xf32>
    %125 = arith.mulf %120, %124 : vector<16x16xf32>
    %cst_46 = arith.constant dense<0.000000e+00> : vector<16x8xf32>
    %126 = tpu.matmul %125, %111, %cst_46 {dimension_numbers = #tpu.dot_dimension_numbers<[1], [0], [0], [1], [0, 0, 1, 1], [], []>} : vector<16x16xf32>, vector<16x8xf32>, vector<16x8xf32> -> vector<16x8xf32>
    %c224 = arith.constant 224 : index
    %c0_47 = arith.constant 0 : index
    %127 = vector.load %arg4[%c224, %c0_47] : memref<504x96xf32, #tpu.memory_space<vmem>>, vector<8x32xf32>
    %cst_48 = arith.constant dense<0.000000e+00> : vector<16x32xf32>
    %128 = tpu.matmul %126, %127, %cst_48 {dimension_numbers = #tpu.dot_dimension_numbers<[1], [0], [0], [1], [0, 0, 1, 1], [], []>} : vector<16x8xf32>, vector<8x32xf32>, vector<16x32xf32> -> vector<16x32xf32>
    %129 = arith.addf %108, %128 : vector<16x32xf32>
    %130 = vector.extract_strided_slice %86 {offsets = [0, 16], sizes = [16, 8], strides = [1, 1]} : vector<16x96xf32> to vector<16x8xf32>
    %131 = vector.extract_strided_slice %86 {offsets = [0, 48], sizes = [16, 8], strides = [1, 1]} : vector<16x96xf32> to vector<16x8xf32>
    %132 = vector.extract_strided_slice %86 {offsets = [0, 80], sizes = [16, 8], strides = [1, 1]} : vector<16x96xf32> to vector<16x8xf32>
    %cst_49 = arith.constant dense<0.000000e+00> : vector<16x16xf32>
    %133 = tpu.matmul %130, %131, %cst_49 {dimension_numbers = #tpu.dot_dimension_numbers<[1], [1], [0], [0], [0, 0, 1, 0], [], []>} : vector<16x8xf32>, vector<16x8xf32>, vector<16x16xf32> -> vector<16x16xf32>
    %cst_50 = arith.constant 0.353553385 : f32
    %134 = vector.broadcast %cst_50 : f32 to vector<16x16xf32>
    %135 = arith.mulf %133, %134 : vector<16x16xf32>
    %136 = arith.addf %135, %81 : vector<16x16xf32>
    %cst_51 = arith.constant dense<0xFF800000> : vector<16xf32>
    %137 = vector.multi_reduction <maximumf>, %136, %cst_51 [1] : vector<16x16xf32> to vector<16xf32>
    %138 = vector.shape_cast %137 : vector<16xf32> to vector<16x1xf32>
    %139 = vector.broadcast %138 : vector<16x1xf32> to vector<16x16xf32>
    %140 = arith.subf %136, %139 : vector<16x16xf32>
    %141 = math.exp %140 : vector<16x16xf32>
    %cst_52 = arith.constant dense<0.000000e+00> : vector<16xf32>
    %142 = vector.multi_reduction <add>, %141, %cst_52 [1] : vector<16x16xf32> to vector<16xf32>
    %143 = vector.shape_cast %142 : vector<16xf32> to vector<16x1xf32>
    %144 = tpu.reciprocal %143 {approx = true} : vector<16x1xf32> -> vector<16x1xf32>
    %145 = vector.broadcast %144 : vector<16x1xf32> to vector<16x16xf32>
    %146 = arith.mulf %141, %145 : vector<16x16xf32>
    %cst_53 = arith.constant dense<0.000000e+00> : vector<16x8xf32>
    %147 = tpu.matmul %146, %132, %cst_53 {dimension_numbers = #tpu.dot_dimension_numbers<[1], [0], [0], [1], [0, 0, 1, 1], [], []>} : vector<16x16xf32>, vector<16x8xf32>, vector<16x8xf32> -> vector<16x8xf32>
    %c232 = arith.constant 232 : index
    %c0_54 = arith.constant 0 : index
    %148 = vector.load %arg4[%c232, %c0_54] : memref<504x96xf32, #tpu.memory_space<vmem>>, vector<8x32xf32>
    %cst_55 = arith.constant dense<0.000000e+00> : vector<16x32xf32>
    %149 = tpu.matmul %147, %148, %cst_55 {dimension_numbers = #tpu.dot_dimension_numbers<[1], [0], [0], [1], [0, 0, 1, 1], [], []>} : vector<16x8xf32>, vector<8x32xf32>, vector<16x32xf32> -> vector<16x32xf32>
    %150 = arith.addf %129, %149 : vector<16x32xf32>
    %151 = vector.extract_strided_slice %86 {offsets = [0, 24], sizes = [16, 8], strides = [1, 1]} : vector<16x96xf32> to vector<16x8xf32>
    %152 = vector.extract_strided_slice %86 {offsets = [0, 56], sizes = [16, 8], strides = [1, 1]} : vector<16x96xf32> to vector<16x8xf32>
    %153 = vector.extract_strided_slice %86 {offsets = [0, 88], sizes = [16, 8], strides = [1, 1]} : vector<16x96xf32> to vector<16x8xf32>
    %cst_56 = arith.constant dense<0.000000e+00> : vector<16x16xf32>
    %154 = tpu.matmul %151, %152, %cst_56 {dimension_numbers = #tpu.dot_dimension_numbers<[1], [1], [0], [0], [0, 0, 1, 0], [], []>} : vector<16x8xf32>, vector<16x8xf32>, vector<16x16xf32> -> vector<16x16xf32>
    %cst_57 = arith.constant 0.353553385 : f32
    %155 = vector.broadcast %cst_57 : f32 to vector<16x16xf32>
    %156 = arith.mulf %154, %155 : vector<16x16xf32>
    %157 = arith.addf %156, %81 : vector<16x16xf32>
    %cst_58 = arith.constant dense<0xFF800000> : vector<16xf32>
    %158 = vector.multi_reduction <maximumf>, %157, %cst_58 [1] : vector<16x16xf32> to vector<16xf32>
    %159 = vector.shape_cast %158 : vector<16xf32> to vector<16x1xf32>
    %160 = vector.broadcast %159 : vector<16x1xf32> to vector<16x16xf32>
    %161 = arith.subf %157, %160 : vector<16x16xf32>
    %162 = math.exp %161 : vector<16x16xf32>
    %cst_59 = arith.constant dense<0.000000e+00> : vector<16xf32>
    %163 = vector.multi_reduction <add>, %162, %cst_59 [1] : vector<16x16xf32> to vector<16xf32>
    %164 = vector.shape_cast %163 : vector<16xf32> to vector<16x1xf32>
    %165 = tpu.reciprocal %164 {approx = true} : vector<16x1xf32> -> vector<16x1xf32>
    %166 = vector.broadcast %165 : vector<16x1xf32> to vector<16x16xf32>
    %167 = arith.mulf %162, %166 : vector<16x16xf32>
    %cst_60 = arith.constant dense<0.000000e+00> : vector<16x8xf32>
    %168 = tpu.matmul %167, %153, %cst_60 {dimension_numbers = #tpu.dot_dimension_numbers<[1], [0], [0], [1], [0, 0, 1, 1], [], []>} : vector<16x16xf32>, vector<16x8xf32>, vector<16x8xf32> -> vector<16x8xf32>
    %c240 = arith.constant 240 : index
    %c0_61 = arith.constant 0 : index
    %169 = vector.load %arg4[%c240, %c0_61] : memref<504x96xf32, #tpu.memory_space<vmem>>, vector<8x32xf32>
    %cst_62 = arith.constant dense<0.000000e+00> : vector<16x32xf32>
    %170 = tpu.matmul %168, %169, %cst_62 {dimension_numbers = #tpu.dot_dimension_numbers<[1], [0], [0], [1], [0, 0, 1, 1], [], []>} : vector<16x8xf32>, vector<8x32xf32>, vector<16x32xf32> -> vector<16x32xf32>
    %171 = arith.addf %150, %170 : vector<16x32xf32>
    %c8_63 = arith.constant 8 : index
    %c0_64 = arith.constant 0 : index
    %172 = vector.load %arg3[%c8_63, %c0_64] : memref<23x96xf32, #tpu.memory_space<vmem>>, vector<1x32xf32>
    %173 = vector.broadcast %172 : vector<1x32xf32> to vector<16x32xf32>
    %174 = arith.addf %171, %173 : vector<16x32xf32>
    %175 = arith.addf %174, %74 : vector<16x32xf32>
    %c9 = arith.constant 9 : index
    %c0_65 = arith.constant 0 : index
    %176 = vector.load %arg3[%c9, %c0_65] : memref<23x96xf32, #tpu.memory_space<vmem>>, vector<1x32xf32>
    %c10 = arith.constant 10 : index
    %c0_66 = arith.constant 0 : index
    %177 = vector.load %arg3[%c10, %c0_66] : memref<23x96xf32, #tpu.memory_space<vmem>>, vector<1x32xf32>
    %cst_67 = arith.constant dense<0.000000e+00> : vector<16xf32>
    %178 = vector.multi_reduction <add>, %175, %cst_67 [1] : vector<16x32xf32> to vector<16xf32>
    %179 = vector.shape_cast %178 : vector<16xf32> to vector<16x1xf32>
    %cst_68 = arith.constant 3.200000e+01 : f32
    %180 = vector.broadcast %cst_68 : f32 to vector<16x1xf32>
    %181 = arith.divf %179, %180 : vector<16x1xf32>
    %182 = vector.broadcast %181 : vector<16x1xf32> to vector<16x32xf32>
    %183 = arith.subf %175, %182 : vector<16x32xf32>
    %184 = arith.mulf %183, %183 : vector<16x32xf32>
    %cst_69 = arith.constant dense<0.000000e+00> : vector<16xf32>
    %185 = vector.multi_reduction <add>, %184, %cst_69 [1] : vector<16x32xf32> to vector<16xf32>
    %186 = vector.shape_cast %185 : vector<16xf32> to vector<16x1xf32>
    %cst_70 = arith.constant 3.200000e+01 : f32
    %187 = vector.broadcast %cst_70 : f32 to vector<16x1xf32>
    %188 = arith.divf %186, %187 : vector<16x1xf32>
    %189 = vector.broadcast %181 : vector<16x1xf32> to vector<16x32xf32>
    %190 = arith.subf %175, %189 : vector<16x32xf32>
    %cst_71 = arith.constant 9.99999996E-13 : f32
    %191 = vector.broadcast %cst_71 : f32 to vector<16x1xf32>
    %192 = arith.addf %188, %191 : vector<16x1xf32>
    %193 = math.rsqrt %192 : vector<16x1xf32>
    %194 = vector.broadcast %193 : vector<16x1xf32> to vector<16x32xf32>
    %195 = arith.mulf %190, %194 : vector<16x32xf32>
    %196 = vector.broadcast %176 : vector<1x32xf32> to vector<16x32xf32>
    %197 = arith.mulf %195, %196 : vector<16x32xf32>
    %198 = vector.broadcast %177 : vector<1x32xf32> to vector<16x32xf32>
    %199 = arith.addf %197, %198 : vector<16x32xf32>
    %c248 = arith.constant 248 : index
    %c0_72 = arith.constant 0 : index
    %200 = vector.load %arg4[%c248, %c0_72] : memref<504x96xf32, #tpu.memory_space<vmem>>, vector<32x64xf32>
    %cst_73 = arith.constant dense<0.000000e+00> : vector<16x64xf32>
    %201 = tpu.matmul %199, %200, %cst_73 {dimension_numbers = #tpu.dot_dimension_numbers<[1], [0], [0], [1], [0, 0, 1, 1], [], []>} : vector<16x32xf32>, vector<32x64xf32>, vector<16x64xf32> -> vector<16x64xf32>
    %c11 = arith.constant 11 : index
    %c0_74 = arith.constant 0 : index
    %202 = vector.load %arg3[%c11, %c0_74] : memref<23x96xf32, #tpu.memory_space<vmem>>, vector<1x64xf32>
    %203 = vector.broadcast %202 : vector<1x64xf32> to vector<16x64xf32>
    %204 = arith.addf %201, %203 : vector<16x64xf32>
    %cst_75 = arith.constant 5.000000e-01 : f32
    %205 = vector.broadcast %cst_75 : f32 to vector<16x64xf32>
    %206 = arith.mulf %205, %204 : vector<16x64xf32>
    %cst_76 = arith.constant 4.471500e-02 : f32
    %207 = vector.broadcast %cst_76 : f32 to vector<16x64xf32>
    %208 = arith.mulf %207, %204 : vector<16x64xf32>
    %209 = arith.mulf %208, %204 : vector<16x64xf32>
    %210 = arith.mulf %209, %204 : vector<16x64xf32>
    %211 = arith.addf %204, %210 : vector<16x64xf32>
    %cst_77 = arith.constant 0.797884583 : f32
    %212 = vector.broadcast %cst_77 : f32 to vector<16x64xf32>
    %213 = arith.mulf %212, %211 : vector<16x64xf32>
    %214 = math.tanh %213 : vector<16x64xf32>
    %cst_78 = arith.constant 1.000000e+00 : f32
    %215 = vector.broadcast %cst_78 : f32 to vector<16x64xf32>
    %216 = arith.addf %215, %214 : vector<16x64xf32>
    %217 = arith.mulf %206, %216 : vector<16x64xf32>
    %c280 = arith.constant 280 : index
    %c0_79 = arith.constant 0 : index
    %218 = vector.load %arg4[%c280, %c0_79] : memref<504x96xf32, #tpu.memory_space<vmem>>, vector<64x32xf32>
    %cst_80 = arith.constant dense<0.000000e+00> : vector<16x32xf32>
    %219 = tpu.matmul %217, %218, %cst_80 {dimension_numbers = #tpu.dot_dimension_numbers<[1], [0], [0], [1], [0, 0, 1, 1], [], []>} : vector<16x64xf32>, vector<64x32xf32>, vector<16x32xf32> -> vector<16x32xf32>
    %c12 = arith.constant 12 : index
    %c0_81 = arith.constant 0 : index
    %220 = vector.load %arg3[%c12, %c0_81] : memref<23x96xf32, #tpu.memory_space<vmem>>, vector<1x32xf32>
    %221 = vector.broadcast %220 : vector<1x32xf32> to vector<16x32xf32>
    %222 = arith.addf %219, %221 : vector<16x32xf32>
    %223 = arith.addf %222, %199 : vector<16x32xf32>
    %c13 = arith.constant 13 : index
    %c0_82 = arith.constant 0 : index
    %224 = vector.load %arg3[%c13, %c0_82] : memref<23x96xf32, #tpu.memory_space<vmem>>, vector<1x32xf32>
    %c14 = arith.constant 14 : index
    %c0_83 = arith.constant 0 : index
    %225 = vector.load %arg3[%c14, %c0_83] : memref<23x96xf32, #tpu.memory_space<vmem>>, vector<1x32xf32>
    %cst_84 = arith.constant dense<0.000000e+00> : vector<16xf32>
    %226 = vector.multi_reduction <add>, %223, %cst_84 [1] : vector<16x32xf32> to vector<16xf32>
    %227 = vector.shape_cast %226 : vector<16xf32> to vector<16x1xf32>
    %cst_85 = arith.constant 3.200000e+01 : f32
    %228 = vector.broadcast %cst_85 : f32 to vector<16x1xf32>
    %229 = arith.divf %227, %228 : vector<16x1xf32>
    %230 = vector.broadcast %229 : vector<16x1xf32> to vector<16x32xf32>
    %231 = arith.subf %223, %230 : vector<16x32xf32>
    %232 = arith.mulf %231, %231 : vector<16x32xf32>
    %cst_86 = arith.constant dense<0.000000e+00> : vector<16xf32>
    %233 = vector.multi_reduction <add>, %232, %cst_86 [1] : vector<16x32xf32> to vector<16xf32>
    %234 = vector.shape_cast %233 : vector<16xf32> to vector<16x1xf32>
    %cst_87 = arith.constant 3.200000e+01 : f32
    %235 = vector.broadcast %cst_87 : f32 to vector<16x1xf32>
    %236 = arith.divf %234, %235 : vector<16x1xf32>
    %237 = vector.broadcast %229 : vector<16x1xf32> to vector<16x32xf32>
    %238 = arith.subf %223, %237 : vector<16x32xf32>
    %cst_88 = arith.constant 9.99999996E-13 : f32
    %239 = vector.broadcast %cst_88 : f32 to vector<16x1xf32>
    %240 = arith.addf %236, %239 : vector<16x1xf32>
    %241 = math.rsqrt %240 : vector<16x1xf32>
    %242 = vector.broadcast %241 : vector<16x1xf32> to vector<16x32xf32>
    %243 = arith.mulf %238, %242 : vector<16x32xf32>
    %244 = vector.broadcast %224 : vector<1x32xf32> to vector<16x32xf32>
    %245 = arith.mulf %243, %244 : vector<16x32xf32>
    %246 = vector.broadcast %225 : vector<1x32xf32> to vector<16x32xf32>
    %247 = arith.addf %245, %246 : vector<16x32xf32>
    %c344 = arith.constant 344 : index
    %c0_89 = arith.constant 0 : index
    %248 = vector.load %arg4[%c344, %c0_89] : memref<504x96xf32, #tpu.memory_space<vmem>>, vector<32x96xf32>
    %cst_90 = arith.constant dense<0.000000e+00> : vector<16x96xf32>
    %249 = tpu.matmul %247, %248, %cst_90 {dimension_numbers = #tpu.dot_dimension_numbers<[1], [0], [0], [1], [0, 0, 1, 1], [], []>} : vector<16x32xf32>, vector<32x96xf32>, vector<16x96xf32> -> vector<16x96xf32>
    %c15 = arith.constant 15 : index
    %c0_91 = arith.constant 0 : index
    %250 = vector.load %arg3[%c15, %c0_91] : memref<23x96xf32, #tpu.memory_space<vmem>>, vector<1x96xf32>
    %251 = vector.broadcast %250 : vector<1x96xf32> to vector<16x96xf32>
    %252 = arith.addf %249, %251 : vector<16x96xf32>
    %cst_92 = arith.constant 0.000000e+00 : f32
    %253 = vector.broadcast %cst_92 : f32 to vector<16x32xf32>
    %254 = vector.extract_strided_slice %252 {offsets = [0, 0], sizes = [16, 8], strides = [1, 1]} : vector<16x96xf32> to vector<16x8xf32>
    %255 = vector.extract_strided_slice %252 {offsets = [0, 32], sizes = [16, 8], strides = [1, 1]} : vector<16x96xf32> to vector<16x8xf32>
    %256 = vector.extract_strided_slice %252 {offsets = [0, 64], sizes = [16, 8], strides = [1, 1]} : vector<16x96xf32> to vector<16x8xf32>
    %cst_93 = arith.constant dense<0.000000e+00> : vector<16x16xf32>
    %257 = tpu.matmul %254, %255, %cst_93 {dimension_numbers = #tpu.dot_dimension_numbers<[1], [1], [0], [0], [0, 0, 1, 0], [], []>} : vector<16x8xf32>, vector<16x8xf32>, vector<16x16xf32> -> vector<16x16xf32>
    %cst_94 = arith.constant 0.353553385 : f32
    %258 = vector.broadcast %cst_94 : f32 to vector<16x16xf32>
    %259 = arith.mulf %257, %258 : vector<16x16xf32>
    %260 = arith.addf %259, %81 : vector<16x16xf32>
    %cst_95 = arith.constant dense<0xFF800000> : vector<16xf32>
    %261 = vector.multi_reduction <maximumf>, %260, %cst_95 [1] : vector<16x16xf32> to vector<16xf32>
    %262 = vector.shape_cast %261 : vector<16xf32> to vector<16x1xf32>
    %263 = vector.broadcast %262 : vector<16x1xf32> to vector<16x16xf32>
    %264 = arith.subf %260, %263 : vector<16x16xf32>
    %265 = math.exp %264 : vector<16x16xf32>
    %cst_96 = arith.constant dense<0.000000e+00> : vector<16xf32>
    %266 = vector.multi_reduction <add>, %265, %cst_96 [1] : vector<16x16xf32> to vector<16xf32>
    %267 = vector.shape_cast %266 : vector<16xf32> to vector<16x1xf32>
    %268 = tpu.reciprocal %267 {approx = true} : vector<16x1xf32> -> vector<16x1xf32>
    %269 = vector.broadcast %268 : vector<16x1xf32> to vector<16x16xf32>
    %270 = arith.mulf %265, %269 : vector<16x16xf32>
    %cst_97 = arith.constant dense<0.000000e+00> : vector<16x8xf32>
    %271 = tpu.matmul %270, %256, %cst_97 {dimension_numbers = #tpu.dot_dimension_numbers<[1], [0], [0], [1], [0, 0, 1, 1], [], []>} : vector<16x16xf32>, vector<16x8xf32>, vector<16x8xf32> -> vector<16x8xf32>
    %c376 = arith.constant 376 : index
    %c0_98 = arith.constant 0 : index
    %272 = vector.load %arg4[%c376, %c0_98] : memref<504x96xf32, #tpu.memory_space<vmem>>, vector<8x32xf32>
    %cst_99 = arith.constant dense<0.000000e+00> : vector<16x32xf32>
    %273 = tpu.matmul %271, %272, %cst_99 {dimension_numbers = #tpu.dot_dimension_numbers<[1], [0], [0], [1], [0, 0, 1, 1], [], []>} : vector<16x8xf32>, vector<8x32xf32>, vector<16x32xf32> -> vector<16x32xf32>
    %274 = arith.addf %253, %273 : vector<16x32xf32>
    %275 = vector.extract_strided_slice %252 {offsets = [0, 8], sizes = [16, 8], strides = [1, 1]} : vector<16x96xf32> to vector<16x8xf32>
    %276 = vector.extract_strided_slice %252 {offsets = [0, 40], sizes = [16, 8], strides = [1, 1]} : vector<16x96xf32> to vector<16x8xf32>
    %277 = vector.extract_strided_slice %252 {offsets = [0, 72], sizes = [16, 8], strides = [1, 1]} : vector<16x96xf32> to vector<16x8xf32>
    %cst_100 = arith.constant dense<0.000000e+00> : vector<16x16xf32>
    %278 = tpu.matmul %275, %276, %cst_100 {dimension_numbers = #tpu.dot_dimension_numbers<[1], [1], [0], [0], [0, 0, 1, 0], [], []>} : vector<16x8xf32>, vector<16x8xf32>, vector<16x16xf32> -> vector<16x16xf32>
    %cst_101 = arith.constant 0.353553385 : f32
    %279 = vector.broadcast %cst_101 : f32 to vector<16x16xf32>
    %280 = arith.mulf %278, %279 : vector<16x16xf32>
    %281 = arith.addf %280, %81 : vector<16x16xf32>
    %cst_102 = arith.constant dense<0xFF800000> : vector<16xf32>
    %282 = vector.multi_reduction <maximumf>, %281, %cst_102 [1] : vector<16x16xf32> to vector<16xf32>
    %283 = vector.shape_cast %282 : vector<16xf32> to vector<16x1xf32>
    %284 = vector.broadcast %283 : vector<16x1xf32> to vector<16x16xf32>
    %285 = arith.subf %281, %284 : vector<16x16xf32>
    %286 = math.exp %285 : vector<16x16xf32>
    %cst_103 = arith.constant dense<0.000000e+00> : vector<16xf32>
    %287 = vector.multi_reduction <add>, %286, %cst_103 [1] : vector<16x16xf32> to vector<16xf32>
    %288 = vector.shape_cast %287 : vector<16xf32> to vector<16x1xf32>
    %289 = tpu.reciprocal %288 {approx = true} : vector<16x1xf32> -> vector<16x1xf32>
    %290 = vector.broadcast %289 : vector<16x1xf32> to vector<16x16xf32>
    %291 = arith.mulf %286, %290 : vector<16x16xf32>
    %cst_104 = arith.constant dense<0.000000e+00> : vector<16x8xf32>
    %292 = tpu.matmul %291, %277, %cst_104 {dimension_numbers = #tpu.dot_dimension_numbers<[1], [0], [0], [1], [0, 0, 1, 1], [], []>} : vector<16x16xf32>, vector<16x8xf32>, vector<16x8xf32> -> vector<16x8xf32>
    %c384 = arith.constant 384 : index
    %c0_105 = arith.constant 0 : index
    %293 = vector.load %arg4[%c384, %c0_105] : memref<504x96xf32, #tpu.memory_space<vmem>>, vector<8x32xf32>
    %cst_106 = arith.constant dense<0.000000e+00> : vector<16x32xf32>
    %294 = tpu.matmul %292, %293, %cst_106 {dimension_numbers = #tpu.dot_dimension_numbers<[1], [0], [0], [1], [0, 0, 1, 1], [], []>} : vector<16x8xf32>, vector<8x32xf32>, vector<16x32xf32> -> vector<16x32xf32>
    %295 = arith.addf %274, %294 : vector<16x32xf32>
    %296 = vector.extract_strided_slice %252 {offsets = [0, 16], sizes = [16, 8], strides = [1, 1]} : vector<16x96xf32> to vector<16x8xf32>
    %297 = vector.extract_strided_slice %252 {offsets = [0, 48], sizes = [16, 8], strides = [1, 1]} : vector<16x96xf32> to vector<16x8xf32>
    %298 = vector.extract_strided_slice %252 {offsets = [0, 80], sizes = [16, 8], strides = [1, 1]} : vector<16x96xf32> to vector<16x8xf32>
    %cst_107 = arith.constant dense<0.000000e+00> : vector<16x16xf32>
    %299 = tpu.matmul %296, %297, %cst_107 {dimension_numbers = #tpu.dot_dimension_numbers<[1], [1], [0], [0], [0, 0, 1, 0], [], []>} : vector<16x8xf32>, vector<16x8xf32>, vector<16x16xf32> -> vector<16x16xf32>
    %cst_108 = arith.constant 0.353553385 : f32
    %300 = vector.broadcast %cst_108 : f32 to vector<16x16xf32>
    %301 = arith.mulf %299, %300 : vector<16x16xf32>
    %302 = arith.addf %301, %81 : vector<16x16xf32>
    %cst_109 = arith.constant dense<0xFF800000> : vector<16xf32>
    %303 = vector.multi_reduction <maximumf>, %302, %cst_109 [1] : vector<16x16xf32> to vector<16xf32>
    %304 = vector.shape_cast %303 : vector<16xf32> to vector<16x1xf32>
    %305 = vector.broadcast %304 : vector<16x1xf32> to vector<16x16xf32>
    %306 = arith.subf %302, %305 : vector<16x16xf32>
    %307 = math.exp %306 : vector<16x16xf32>
    %cst_110 = arith.constant dense<0.000000e+00> : vector<16xf32>
    %308 = vector.multi_reduction <add>, %307, %cst_110 [1] : vector<16x16xf32> to vector<16xf32>
    %309 = vector.shape_cast %308 : vector<16xf32> to vector<16x1xf32>
    %310 = tpu.reciprocal %309 {approx = true} : vector<16x1xf32> -> vector<16x1xf32>
    %311 = vector.broadcast %310 : vector<16x1xf32> to vector<16x16xf32>
    %312 = arith.mulf %307, %311 : vector<16x16xf32>
    %cst_111 = arith.constant dense<0.000000e+00> : vector<16x8xf32>
    %313 = tpu.matmul %312, %298, %cst_111 {dimension_numbers = #tpu.dot_dimension_numbers<[1], [0], [0], [1], [0, 0, 1, 1], [], []>} : vector<16x16xf32>, vector<16x8xf32>, vector<16x8xf32> -> vector<16x8xf32>
    %c392 = arith.constant 392 : index
    %c0_112 = arith.constant 0 : index
    %314 = vector.load %arg4[%c392, %c0_112] : memref<504x96xf32, #tpu.memory_space<vmem>>, vector<8x32xf32>
    %cst_113 = arith.constant dense<0.000000e+00> : vector<16x32xf32>
    %315 = tpu.matmul %313, %314, %cst_113 {dimension_numbers = #tpu.dot_dimension_numbers<[1], [0], [0], [1], [0, 0, 1, 1], [], []>} : vector<16x8xf32>, vector<8x32xf32>, vector<16x32xf32> -> vector<16x32xf32>
    %316 = arith.addf %295, %315 : vector<16x32xf32>
    %317 = vector.extract_strided_slice %252 {offsets = [0, 24], sizes = [16, 8], strides = [1, 1]} : vector<16x96xf32> to vector<16x8xf32>
    %318 = vector.extract_strided_slice %252 {offsets = [0, 56], sizes = [16, 8], strides = [1, 1]} : vector<16x96xf32> to vector<16x8xf32>
    %319 = vector.extract_strided_slice %252 {offsets = [0, 88], sizes = [16, 8], strides = [1, 1]} : vector<16x96xf32> to vector<16x8xf32>
    %cst_114 = arith.constant dense<0.000000e+00> : vector<16x16xf32>
    %320 = tpu.matmul %317, %318, %cst_114 {dimension_numbers = #tpu.dot_dimension_numbers<[1], [1], [0], [0], [0, 0, 1, 0], [], []>} : vector<16x8xf32>, vector<16x8xf32>, vector<16x16xf32> -> vector<16x16xf32>
    %cst_115 = arith.constant 0.353553385 : f32
    %321 = vector.broadcast %cst_115 : f32 to vector<16x16xf32>
    %322 = arith.mulf %320, %321 : vector<16x16xf32>
    %323 = arith.addf %322, %81 : vector<16x16xf32>
    %cst_116 = arith.constant dense<0xFF800000> : vector<16xf32>
    %324 = vector.multi_reduction <maximumf>, %323, %cst_116 [1] : vector<16x16xf32> to vector<16xf32>
    %325 = vector.shape_cast %324 : vector<16xf32> to vector<16x1xf32>
    %326 = vector.broadcast %325 : vector<16x1xf32> to vector<16x16xf32>
    %327 = arith.subf %323, %326 : vector<16x16xf32>
    %328 = math.exp %327 : vector<16x16xf32>
    %cst_117 = arith.constant dense<0.000000e+00> : vector<16xf32>
    %329 = vector.multi_reduction <add>, %328, %cst_117 [1] : vector<16x16xf32> to vector<16xf32>
    %330 = vector.shape_cast %329 : vector<16xf32> to vector<16x1xf32>
    %331 = tpu.reciprocal %330 {approx = true} : vector<16x1xf32> -> vector<16x1xf32>
    %332 = vector.broadcast %331 : vector<16x1xf32> to vector<16x16xf32>
    %333 = arith.mulf %328, %332 : vector<16x16xf32>
    %cst_118 = arith.constant dense<0.000000e+00> : vector<16x8xf32>
    %334 = tpu.matmul %333, %319, %cst_118 {dimension_numbers = #tpu.dot_dimension_numbers<[1], [0], [0], [1], [0, 0, 1, 1], [], []>} : vector<16x16xf32>, vector<16x8xf32>, vector<16x8xf32> -> vector<16x8xf32>
    %c400 = arith.constant 400 : index
    %c0_119 = arith.constant 0 : index
    %335 = vector.load %arg4[%c400, %c0_119] : memref<504x96xf32, #tpu.memory_space<vmem>>, vector<8x32xf32>
    %cst_120 = arith.constant dense<0.000000e+00> : vector<16x32xf32>
    %336 = tpu.matmul %334, %335, %cst_120 {dimension_numbers = #tpu.dot_dimension_numbers<[1], [0], [0], [1], [0, 0, 1, 1], [], []>} : vector<16x8xf32>, vector<8x32xf32>, vector<16x32xf32> -> vector<16x32xf32>
    %337 = arith.addf %316, %336 : vector<16x32xf32>
    %c16 = arith.constant 16 : index
    %c0_121 = arith.constant 0 : index
    %338 = vector.load %arg3[%c16, %c0_121] : memref<23x96xf32, #tpu.memory_space<vmem>>, vector<1x32xf32>
    %339 = vector.broadcast %338 : vector<1x32xf32> to vector<16x32xf32>
    %340 = arith.addf %337, %339 : vector<16x32xf32>
    %341 = arith.addf %340, %247 : vector<16x32xf32>
    %c17 = arith.constant 17 : index
    %c0_122 = arith.constant 0 : index
    %342 = vector.load %arg3[%c17, %c0_122] : memref<23x96xf32, #tpu.memory_space<vmem>>, vector<1x32xf32>
    %c18 = arith.constant 18 : index
    %c0_123 = arith.constant 0 : index
    %343 = vector.load %arg3[%c18, %c0_123] : memref<23x96xf32, #tpu.memory_space<vmem>>, vector<1x32xf32>
    %cst_124 = arith.constant dense<0.000000e+00> : vector<16xf32>
    %344 = vector.multi_reduction <add>, %341, %cst_124 [1] : vector<16x32xf32> to vector<16xf32>
    %345 = vector.shape_cast %344 : vector<16xf32> to vector<16x1xf32>
    %cst_125 = arith.constant 3.200000e+01 : f32
    %346 = vector.broadcast %cst_125 : f32 to vector<16x1xf32>
    %347 = arith.divf %345, %346 : vector<16x1xf32>
    %348 = vector.broadcast %347 : vector<16x1xf32> to vector<16x32xf32>
    %349 = arith.subf %341, %348 : vector<16x32xf32>
    %350 = arith.mulf %349, %349 : vector<16x32xf32>
    %cst_126 = arith.constant dense<0.000000e+00> : vector<16xf32>
    %351 = vector.multi_reduction <add>, %350, %cst_126 [1] : vector<16x32xf32> to vector<16xf32>
    %352 = vector.shape_cast %351 : vector<16xf32> to vector<16x1xf32>
    %cst_127 = arith.constant 3.200000e+01 : f32
    %353 = vector.broadcast %cst_127 : f32 to vector<16x1xf32>
    %354 = arith.divf %352, %353 : vector<16x1xf32>
    %355 = vector.broadcast %347 : vector<16x1xf32> to vector<16x32xf32>
    %356 = arith.subf %341, %355 : vector<16x32xf32>
    %cst_128 = arith.constant 9.99999996E-13 : f32
    %357 = vector.broadcast %cst_128 : f32 to vector<16x1xf32>
    %358 = arith.addf %354, %357 : vector<16x1xf32>
    %359 = math.rsqrt %358 : vector<16x1xf32>
    %360 = vector.broadcast %359 : vector<16x1xf32> to vector<16x32xf32>
    %361 = arith.mulf %356, %360 : vector<16x32xf32>
    %362 = vector.broadcast %342 : vector<1x32xf32> to vector<16x32xf32>
    %363 = arith.mulf %361, %362 : vector<16x32xf32>
    %364 = vector.broadcast %343 : vector<1x32xf32> to vector<16x32xf32>
    %365 = arith.addf %363, %364 : vector<16x32xf32>
    %c408 = arith.constant 408 : index
    %c0_129 = arith.constant 0 : index
    %366 = vector.load %arg4[%c408, %c0_129] : memref<504x96xf32, #tpu.memory_space<vmem>>, vector<32x64xf32>
    %cst_130 = arith.constant dense<0.000000e+00> : vector<16x64xf32>
    %367 = tpu.matmul %365, %366, %cst_130 {dimension_numbers = #tpu.dot_dimension_numbers<[1], [0], [0], [1], [0, 0, 1, 1], [], []>} : vector<16x32xf32>, vector<32x64xf32>, vector<16x64xf32> -> vector<16x64xf32>
    %c19 = arith.constant 19 : index
    %c0_131 = arith.constant 0 : index
    %368 = vector.load %arg3[%c19, %c0_131] : memref<23x96xf32, #tpu.memory_space<vmem>>, vector<1x64xf32>
    %369 = vector.broadcast %368 : vector<1x64xf32> to vector<16x64xf32>
    %370 = arith.addf %367, %369 : vector<16x64xf32>
    %cst_132 = arith.constant 5.000000e-01 : f32
    %371 = vector.broadcast %cst_132 : f32 to vector<16x64xf32>
    %372 = arith.mulf %371, %370 : vector<16x64xf32>
    %cst_133 = arith.constant 4.471500e-02 : f32
    %373 = vector.broadcast %cst_133 : f32 to vector<16x64xf32>
    %374 = arith.mulf %373, %370 : vector<16x64xf32>
    %375 = arith.mulf %374, %370 : vector<16x64xf32>
    %376 = arith.mulf %375, %370 : vector<16x64xf32>
    %377 = arith.addf %370, %376 : vector<16x64xf32>
    %cst_134 = arith.constant 0.797884583 : f32
    %378 = vector.broadcast %cst_134 : f32 to vector<16x64xf32>
    %379 = arith.mulf %378, %377 : vector<16x64xf32>
    %380 = math.tanh %379 : vector<16x64xf32>
    %cst_135 = arith.constant 1.000000e+00 : f32
    %381 = vector.broadcast %cst_135 : f32 to vector<16x64xf32>
    %382 = arith.addf %381, %380 : vector<16x64xf32>
    %383 = arith.mulf %372, %382 : vector<16x64xf32>
    %c440 = arith.constant 440 : index
    %c0_136 = arith.constant 0 : index
    %384 = vector.load %arg4[%c440, %c0_136] : memref<504x96xf32, #tpu.memory_space<vmem>>, vector<64x32xf32>
    %cst_137 = arith.constant dense<0.000000e+00> : vector<16x32xf32>
    %385 = tpu.matmul %383, %384, %cst_137 {dimension_numbers = #tpu.dot_dimension_numbers<[1], [0], [0], [1], [0, 0, 1, 1], [], []>} : vector<16x64xf32>, vector<64x32xf32>, vector<16x32xf32> -> vector<16x32xf32>
    %c20 = arith.constant 20 : index
    %c0_138 = arith.constant 0 : index
    %386 = vector.load %arg3[%c20, %c0_138] : memref<23x96xf32, #tpu.memory_space<vmem>>, vector<1x32xf32>
    %387 = vector.broadcast %386 : vector<1x32xf32> to vector<16x32xf32>
    %388 = arith.addf %385, %387 : vector<16x32xf32>
    %389 = arith.addf %388, %365 : vector<16x32xf32>
    %c21 = arith.constant 21 : index
    %c0_139 = arith.constant 0 : index
    %390 = vector.load %arg3[%c21, %c0_139] : memref<23x96xf32, #tpu.memory_space<vmem>>, vector<1x32xf32>
    %c22 = arith.constant 22 : index
    %c0_140 = arith.constant 0 : index
    %391 = vector.load %arg3[%c22, %c0_140] : memref<23x96xf32, #tpu.memory_space<vmem>>, vector<1x32xf32>
    %cst_141 = arith.constant dense<0.000000e+00> : vector<16xf32>
    %392 = vector.multi_reduction <add>, %389, %cst_141 [1] : vector<16x32xf32> to vector<16xf32>
    %393 = vector.shape_cast %392 : vector<16xf32> to vector<16x1xf32>
    %cst_142 = arith.constant 3.200000e+01 : f32
    %394 = vector.broadcast %cst_142 : f32 to vector<16x1xf32>
    %395 = arith.divf %393, %394 : vector<16x1xf32>
    %396 = vector.broadcast %395 : vector<16x1xf32> to vector<16x32xf32>
    %397 = arith.subf %389, %396 : vector<16x32xf32>
    %398 = arith.mulf %397, %397 : vector<16x32xf32>
    %cst_143 = arith.constant dense<0.000000e+00> : vector<16xf32>
    %399 = vector.multi_reduction <add>, %398, %cst_143 [1] : vector<16x32xf32> to vector<16xf32>
    %400 = vector.shape_cast %399 : vector<16xf32> to vector<16x1xf32>
    %cst_144 = arith.constant 3.200000e+01 : f32
    %401 = vector.broadcast %cst_144 : f32 to vector<16x1xf32>
    %402 = arith.divf %400, %401 : vector<16x1xf32>
    %403 = vector.broadcast %395 : vector<16x1xf32> to vector<16x32xf32>
    %404 = arith.subf %389, %403 : vector<16x32xf32>
    %cst_145 = arith.constant 9.99999996E-13 : f32
    %405 = vector.broadcast %cst_145 : f32 to vector<16x1xf32>
    %406 = arith.addf %402, %405 : vector<16x1xf32>
    %407 = math.rsqrt %406 : vector<16x1xf32>
    %408 = vector.broadcast %407 : vector<16x1xf32> to vector<16x32xf32>
    %409 = arith.mulf %404, %408 : vector<16x32xf32>
    %410 = vector.broadcast %390 : vector<1x32xf32> to vector<16x32xf32>
    %411 = arith.mulf %409, %410 : vector<16x32xf32>
    %412 = vector.broadcast %391 : vector<1x32xf32> to vector<16x32xf32>
    %413 = arith.addf %411, %412 : vector<16x32xf32>
    %cst_146 = arith.constant 1.250000e-01 : f32
    %414 = vector.broadcast %cst_146 : f32 to vector<2x16xf32>
    %415 = arith.mulf %38, %414 : vector<2x16xf32>
    %cst_147 = arith.constant dense<0.000000e+00> : vector<2x32xf32>
    %416 = tpu.matmul %415, %413, %cst_147 {dimension_numbers = #tpu.dot_dimension_numbers<[1], [0], [0], [1], [0, 0, 1, 1], [], []>} : vector<2x16xf32>, vector<16x32xf32>, vector<2x32xf32> -> vector<2x32xf32>
    %c56 = arith.constant 56 : index
    %c0_148 = arith.constant 0 : index
    %417 = vector.load %arg4[%c56, %c0_148] : memref<504x96xf32, #tpu.memory_space<vmem>>, vector<32x32xf32>
    %cst_149 = arith.constant dense<0.000000e+00> : vector<2x32xf32>
    %418 = tpu.matmul %416, %417, %cst_149 {dimension_numbers = #tpu.dot_dimension_numbers<[1], [0], [0], [1], [0, 0, 1, 1], [], []>} : vector<2x32xf32>, vector<32x32xf32>, vector<2x32xf32> -> vector<2x32xf32>
    %c5 = arith.constant 5 : index
    %c0_150 = arith.constant 0 : index
    %419 = vector.load %arg3[%c5, %c0_150] : memref<23x96xf32, #tpu.memory_space<vmem>>, vector<1x32xf32>
    %420 = vector.broadcast %419 : vector<1x32xf32> to vector<2x32xf32>
    %421 = arith.addf %418, %420 : vector<2x32xf32>
    %422 = math.tanh %421 : vector<2x32xf32>
    %c88 = arith.constant 88 : index
    %c0_151 = arith.constant 0 : index
    %423 = vector.load %arg4[%c88, %c0_151] : memref<504x96xf32, #tpu.memory_space<vmem>>, vector<32x3xf32>
    %cst_152 = arith.constant dense<0.000000e+00> : vector<2x3xf32>
    %424 = tpu.matmul %422, %423, %cst_152 {dimension_numbers = #tpu.dot_dimension_numbers<[1], [0], [0], [1], [0, 0, 1, 1], [], []>} : vector<2x32xf32>, vector<32x3xf32>, vector<2x3xf32> -> vector<2x3xf32>
    %c6 = arith.constant 6 : index
    %c0_153 = arith.constant 0 : index
    %425 = vector.load %arg3[%c6, %c0_153] : memref<23x96xf32, #tpu.memory_space<vmem>>, vector<1x3xf32>
    %426 = vector.broadcast %425 : vector<1x3xf32> to vector<2x3xf32>
    %427 = arith.addf %424, %426 : vector<2x3xf32>
    %c0_154 = arith.constant 0 : index
    %c0_155 = arith.constant 0 : index
    %428 = vector.load %arg5[%c0_154, %c0_155] : memref<2x3xf32, #tpu.memory_space<vmem>>, vector<2x3xf32>
    tpu.vector_store %arg5[%c0_154, %c0_155], %427 {strides = array<i32>} : memref<2x3xf32, #tpu.memory_space<vmem>>, vector<2x3xf32>,
    return
  }
}

</mosaic_0001>

<bundles_post_ra>
// kernel: regression_model_forward.1
= control target key start
LH: loop header
LB: loop body
LE: loop exit
PB: predicated region body
PF: predicated region fallthrough
CT: control target
= control target key end

     0   :  { %vm25_vm0 = vcmask 64512   ;;  %s2808_s0 = inlined_call_operand.vmem [shape: f32[2,8], index: 0, kind: input, shape index: {}]   ;;  %s2809_s1 = inlined_call_operand.vmem [shape: f32[16,16], index: 1, kind: input, shape index: {}]   ;;  %s2810_s2 = inlined_call_operand.vmem [shape: f32[1,16], index: 2, kind: input, shape index: {}]   ;;  %s2811_s3 = inlined_call_operand.vmem [shape: f32[23,96], index: 3, kind: input, shape index: {}]   ;;  %s2812_s4 = inlined_call_operand.vmem [shape: f32[504,96], index: 4, kind: input, shape index: {}]   ;;  %s2813_s5 = inlined_call_operand.hbm [shape: f32[2,3], index: 5, kind: output, shape index: {}]  }
   0x1   :  { %v22_v0 = vld [vmem:[%s2812_s4] sm:$0xff] }
   0x2   :  { %v21_v1 = vld [vmem:[%s2808_s0] sm:$0x3]  ;;  %44 = vmatpush.msra.mxu0 %v22_v0 }
   0x3   :  { %1915 = vmatmul.msk.f32.vlgmr.msra.gmra.mxu0 %vm25_vm0, %v21_v1 }
   0x4   :  { %10 = vsyncpa [#allocation3], 0  ;;  %v72_v2 = vld [vmem:[%s2812_s4 + $0x20] sm:$0xff]  ;;  %v71_v3 = vld [vmem:[%s2812_s4 + $0x18] sm:$0xff]  ;;  %vm163_vm1 = vcmask 130048   ;;  %vm75_vm6 = vcmask 261120   ;;  %v99_v27 = vlaneseq }
   0x5   :  { %91 = vmatpush.msra.mxu1 %v72_v2  ;;  %v2062_v4 = vld [vmem:[%s2811_s3] ss:$0 sm:$0xff]  ;;  %v70_v5 = vld [vmem:[%s2812_s4 + $0x10] sm:$0xff]  ;;  %v69_v6 = vld [vmem:[%s2812_s4 + $0x8] sm:$0xff]  ;;  %vm130_vm10 = vcmask 1041408   ;;  %v2212_v36 = vmov 0.0  }
   0x6   :  { %v160_v9 = vld [vmem:[%s2812_s4 + $0x30] sm:$0xff]  ;;  %v159_v10 = vld [vmem:[%s2812_s4 + $0x28] sm:$0xff]  ;;  %v157_v11 = vld [vmem:[%s2809_s1] sm:$0xff]  ;;  %v2293_v28 = vand.u32 127, %v99_v27  ;;  %v2296_v30 = vshrl.u32 %v99_v27, 7  ;;  %vm123_vm11 = vcmask 15360  }
   0x7   :  { %92 = vmatpush.msra.mxu1 %v71_v3  ;;  %184 = vmatpush.msra.mxu3 %v160_v9  ;;  %v158_v26 = vld [vmem:[%s2809_s1 + $0x8] sm:$0xff]  ;;  %v2063_v32 = vld [vmem:[%s2811_s3 + $0x1] ss:$0 sm:$0xff]  ;;  %v2064_v40 = vld [vmem:[%s2811_s3 + $0x2] ss:$0 sm:$0xff]  ;;  %v2213_v53 = vmov 32.0  }
   0x8   :  { %v104_v29 = vmul.u32 8, %v2293_v28  ;;  %v101_v33 = vadd.s32 8, %v2296_v30  ;;  %v219_v42 = vld [vmem:[%s2812_s4 + $0x78] sm:$0xff]  ;;  %s2214_s7 = smov 96   ;;  %s2216_s10 = smov 88  }
   0x9   :  { %93 = vmatpush.msra.mxu1 %v70_v5  ;;  %185 = vmatpush.msra.mxu3 %v159_v10  ;;  %v291_v9 = vld [vmem:[%s2812_s4 + $0xb8] sm:$0xff]  ;;  %s2217_s11 = smov 120   ;;  %s2218_s12 = smov 72  }
   0xa   :  { %1924 = vmatmul.msk.f32.vlgmr.msra.gmra.mxu3 %vm163_vm1, %v157_v11  ;;  %v107_v31 = vadd.s32 8, %v104_v29  ;;  %vm105_vm7 = vcmp.ge.s32.totalorder %v2296_v30, %v104_v29  ;;  %vm106_vm12 = vcmp.ge.s32.totalorder %v101_v33, %v104_v29  ;;  %v2066_v29 = vld [vmem:[%s2811_s3 + $0x4] ss:$0 sm:$0xff]  ;;  %s2219_s13 = smov 104   ;;  %s2220_s14 = smov 80  }
   0xb   :  { %94 = vmatpush.msra.mxu1 %v69_v6  ;;  %v294_v6 = vld [vmem:[%s2812_s4 + $0xd0] sm:$0xff]  ;;  %s2221_s15 = smov 112   ;;  %s2222_s17 = smov 56  }
   0xc   :  { %vm108_vm8 = vcmp.lt.s32.totalorder %v2296_v30, %v107_v31  ;;  %vm109_vm13 = vcmp.lt.s32.totalorder %v101_v33, %v107_v31  ;;  %s2223_s18 = smov 40   ;;  %s2224_s19 = smov 48  }
   0xd   :  { %vm110_vm9 = vmand %vm105_vm7, %vm108_vm8  ;;  %315 = vmatpush.msrb.mxu1 %v294_v6  ;;  %s1906_s25 = sshll.u32 %s2813_s5, 4  ;;  %s1907_s25 = int_to_ptr.hbm [resolvable:$true] %s1906_s25 }
   0xe   :  { %v2305_v37 = vsel %vm110_vm9, 1.0, %v2212_v36  ;;  %vm111_vm14 = vmand %vm106_vm12, %vm109_vm13 }
   0xf   :  { %v2311_v38 = vsel %vm111_vm14, 1.0, %v2212_v36 }
  0x12   :  { %1925 = vmatmul.msk.f32.gmra.mxu3 %vm163_vm1, %v158_v26 }
  0x80   :  { %v46_v7 = vpop.f32.mrf.mxu0 }
  0x81   :  { %v47_v8 = vadd.f32 %v2062_v4, %v46_v7  ;;  %v293_v7 = vld [vmem:[%s2812_s4 + $0xc8] sm:$0xff] }
  0x82   :  { %316 = vmatpush.msrb.mxu1 %v293_v7 }
  0x83   :  { %v1916_v12 = vmul.f32 -1.442695, %v47_v8 }
  0x85   :  { %2086 = vpow2.f32 %v1916_v12 }
  0x8b   :  { %v2087_v13 = vpop.eup %2086 }
  0x8c   :  { %v52_v14 = vadd.f32 1.0, %v2087_v13 }
  0x8d   :  { %v187_v39 = vpop.f32.mrf.mxu3 }
  0x8e   :  { %2088 = vrcp.f32 %v52_v14  ;;  %v64_v18 = vand.u32 2147483648, %v52_v14  ;;  %v62_v20 = vand.u32 2147483647, %v52_v14  ;;  %vm58_vm3 = vweird.f32 %v52_v14 }
  0x8f   :  { %v188_v41 = vadd.f32 %v2064_v40, %v187_v39  ;;  %2090 = vrcp.f32 %v2213_v53 }
  0x90   :  { %v65_v22 = vor.u32 1.1754944e-38, %v64_v18  ;;  %vm63_vm5 = vcmp.eq.f32.partialorder %v62_v20, 8.507059e+37 }
  0x91   :  { %v220_v43 = vadd.f32 %v219_v42, %v188_v41 }
  0x94   :  { %v2089_v15 = vpop.eup %2088 }
  0x95   :  { %v54_v16 = vmul.f32 %v2089_v15, %v52_v14  ;;  %vm59_vm2 = vweird.f32 %v2089_v15  ;;  %v190_v44 = vpop.f32.mrf.mxu3  ;;  %v2091_v54 = vpop.eup %2090 }
  0x96   :  { %vm60_vm4 = vmor %vm58_vm3, %vm59_vm2  ;;  %v191_v47 = vadd.f32 %v2064_v40, %v190_v44  ;;  %v233_v55 = vmul.f32 32.0, %v2091_v54  ;;  %vm237_vm15 = vweird.f32 %v2091_v54 }
  0x97   :  { %v55_v17 = vsub.f32 1.0, %v54_v16 }
  0x98   :  { %v221_v49 = vadd.f32 %v219_v42, %v191_v47  ;;  %v234_v56 = vsub.f32 1.0, %v233_v55 }
  0x99   :  { %v56_v19 = vmul.f32 %v2089_v15, %v55_v17 }
  0x9a   :  { %v235_v57 = vmul.f32 %v2091_v54, %v234_v56 }
  0x9b   :  { %v57_v21 = vadd.f32 %v2089_v15, %v56_v19 }
  0x9c   :  { %v236_v58 = vadd.f32 %v2091_v54, %v235_v57 }
  0x9d   :  { %v61_v23 = vsel %vm60_vm4, %v2089_v15, %v57_v21 }
  0x9e   :  { %v66_v24 = vsel %vm63_vm5, %v65_v22, %v61_v23  ;;  %v2323_v59 = vsel %vm237_vm15, %v2091_v54, %v236_v58 }
  0x9f   :  { %v68_v25 = vmul.f32 %v66_v24, %v47_v8  ;;  %v292_v8 = vld [vmem:[%s2812_s4 + $0xc0] sm:$0xff] }
  0xa0   :  { %317 = vmatpush.msrb.mxu1 %v292_v8  ;;  %v2065_v24 = vld [vmem:[%s2811_s3 + $0x3] ss:$0 sm:$0xff] }
  0xa1   :  { %1917 = vmatmul.msk.f32.vlgmr.msra.gmra.mxu1 %vm75_vm6, %v68_v25 }
  0xa2   :  { %318 = vmatpush.msrb.mxu1 %v291_v9 }
 0x11e   :  { %v96_v34 = vpop.f32.mrf.mxu1 }
 0x11f   :  { %v97_v35 = vadd.f32 %v2063_v32, %v96_v34 }
 0x121   :  { %1926 = vmatpush.msk.msrb.mxu0 %vm130_vm10, %v97_v35 }
 0x122   :  { %1927 = vmatmul.msk.f32.vlgmr.msrb.gmra.mxu0 %vm123_vm11, %v2305_v37 }
 0x12a   :  { %1928 = vmatmul.msk.f32.gmra.mxu0 %vm123_vm11, %v2311_v38 }
 0x19f   :  { %v213_v45 = vpop.f32.mrf.mxu0 }
 0x1a0   :  { %v222_v46 = vadd.f32 %v220_v43, %v213_v45  ;;  %v116_v43 = vmul.u32 8, %v2296_v30  ;;  %v2067_v30 = vld [vmem:[%s2811_s3 + $0x7] ss:$0 sm:$0xff] }
 0x1a2   :  { %v226_v48 = vsel %vm75_vm6, %v222_v46, 0.0  ;;  %vm117_vm9 = vcmp.ge.s32.totalorder %v2293_v28, %v116_v43  ;;  %v118_v44 = vadd.s32 8, %v116_v43 }
 0x1a3   :  { %227 = vadd.xlane.f32.xlu0 %v226_v48 }
 0x1a4   :  { %vm119_vm12 = vcmp.lt.s32.totalorder %v2293_v28, %v118_v44 }
 0x1a5   :  { %vm120_vm13 = vmand %vm117_vm9, %vm119_vm12 }
 0x1a6   :  { %v2361_v45 = vsel %vm120_vm13, 1.0, %v2212_v36 }
 0x1a7   :  { %v216_v50 = vpop.f32.mrf.mxu0  ;;  %1921 = vmatpush.msk.msra.mxu2 %vm130_vm10, %v2361_v45 }
 0x1a8   :  { %v223_v51 = vadd.f32 %v221_v49, %v216_v50  ;;  %1922 = vmatmul.msk.f32.vlgmr.msra.gmra.mxu2 %vm123_vm11, %v2305_v37  ;;  %v2068_v50 = vld [vmem:[%s2810_s2] ss:$0 sm:$0xff]  ;;  %s2215_s2 = smov 64  }
 0x1aa   :  { %v229_v52 = vsel %vm75_vm6, %v223_v51, 0.0 }
 0x1ab   :  { %230 = vadd.xlane.f32.xlu0 %v229_v52 }
 0x1b0   :  { %1923 = vmatmul.msk.f32.gmra.mxu2 %vm123_vm11, %v2311_v38 }
 0x216   :  { %v228_v60 = vpop.xlane.xlu0 %227 }
 0x217   :  { %v239_v61 = vmul.f32 %v2323_v59, %v228_v60 }
 0x219   :  { %v241_v62 = vsub.f32 %v222_v46, %v239_v61 }
 0x21b   :  { %v243_v63 = vmul.f32 %v241_v62, %v241_v62 }
 0x21d   :  { %v245_v0 = vsel %vm75_vm6, %v243_v63, 0.0 }
 0x21e   :  { %246 = vadd.xlane.f32.xlu1 %v245_v0  ;;  %v231_v1 = vpop.xlane.xlu0 %230 }
 0x21f   :  { %v240_v2 = vmul.f32 %v2323_v59, %v231_v1 }
 0x221   :  { %v242_v3 = vsub.f32 %v223_v51, %v240_v2 }
 0x223   :  { %v244_v4 = vmul.f32 %v242_v3, %v242_v3 }
 0x225   :  { %v248_v5 = vsel %vm75_vm6, %v244_v4, 0.0 }
 0x226   :  { %249 = vadd.xlane.f32.xlu1 %v248_v5 }
 0x22b   :  { %v151_v38 = vpop.f32.mrf.mxu2 }
 0x22c   :  { %vm287_vm10 = vcmp.gt.f32.partialorder %v151_v38, 0.5 }
 0x22d   :  { %v2385_v53 = vsel %vm287_vm10, %v2068_v50, -1e+09 }
 0x233   :  { %v154_v49 = vpop.f32.mrf.mxu2 }
 0x234   :  { %vm288_vm11 = vcmp.gt.f32.partialorder %v154_v49, 0.5 }
 0x235   :  { %v2389_v58 = vsel %vm288_vm11, %v2068_v50, -1e+09 }
 0x291   :  { %v247_v10 = vpop.xlane.xlu1 %246 }
 0x292   :  { %v251_v11 = vmul.f32 %v247_v10, %v2323_v59 }
 0x294   :  { %v253_v12 = vadd.f32 1e-12, %v251_v11 }
 0x296   :  { %2092 = vrsqrt.f32 %v253_v12  ;;  %vm261_vm3 = vweird.f32 %v253_v12 }
 0x299   :  { %v250_v13 = vpop.xlane.xlu1 %249 }
 0x29a   :  { %v252_v14 = vmul.f32 %v250_v13, %v2323_v59 }
 0x29c   :  { %v2093_v15 = vpop.eup %2092  ;;  %v254_v16 = vadd.f32 1e-12, %v252_v14 }
 0x29d   :  { %v256_v17 = vmul.f32 %v2093_v15, %v253_v12  ;;  %vm262_vm2 = vweird.f32 %v2093_v15  ;;  %v424_v12 = vld [vmem:[%s2812_s4 + $0xd8] sm:$0xff] }
 0x29e   :  { %2094 = vrsqrt.f32 %v254_v16  ;;  %vm263_vm4 = vmor %vm261_vm3, %vm262_vm2  ;;  %vm271_vm7 = vweird.f32 %v254_v16 }
 0x29f   :  { %v257_v18 = vmul.f32 %v2093_v15, %v256_v17 }
 0x2a1   :  { %v258_v19 = vmul.f32 0.5, %v257_v18 }
 0x2a3   :  { %v259_v20 = vsub.f32 1.5, %v258_v19 }
 0x2a4   :  { %v2095_v21 = vpop.eup %2094 }
 0x2a5   :  { %v260_v22 = vmul.f32 %v2093_v15, %v259_v20  ;;  %v266_v23 = vmul.f32 %v2095_v21, %v254_v16  ;;  %vm272_vm5 = vweird.f32 %v2095_v21 }
 0x2a6   :  { %vm273_vm8 = vmor %vm271_vm7, %vm272_vm5  ;;  %vm969_vm7 = vcmask 523264  }
 0x2a7   :  { %v264_v25 = vsel %vm263_vm4, %v2093_v15, %v260_v22  ;;  %v267_v26 = vmul.f32 %v2095_v21, %v266_v23 }
 0x2a8   :  { %v275_v27 = vmul.f32 %v264_v25, %v241_v62 }
 0x2a9   :  { %v268_v31 = vmul.f32 0.5, %v267_v26 }
 0x2aa   :  { %v278_v32 = vmul.f32 %v2065_v24, %v275_v27 }
 0x2ab   :  { %v269_v33 = vsub.f32 1.5, %v268_v31 }
 0x2ac   :  { %v2349_v34 = vadd.f32 %v2066_v29, %v278_v32 }
 0x2ad   :  { %v270_v35 = vmul.f32 %v2095_v21, %v269_v33 }
 0x2ae   :  { %1929 = vmatmul.msk.f32.vlgmr.msrb.gmra.mxu1 %vm75_vm6, %v2349_v34 }
 0x2af   :  { %v274_v39 = vsel %vm273_vm8, %v2095_v21, %v270_v35 }
 0x2b0   :  { %v276_v40 = vmul.f32 %v274_v39, %v242_v3 }
 0x2b2   :  { %v279_v41 = vmul.f32 %v2065_v24, %v276_v40 }
 0x2b4   :  { %v2353_v42 = vadd.f32 %v2066_v29, %v279_v41 }
 0x2b6   :  { %1930 = vmatmul.msk.f32.gmra.mxu1 %vm75_vm6, %v2353_v42 }
 0x32b   :  { %v320_v46 = vpop.f32.mrf.mxu1 }
 0x32c   :  { %v321_v36 = vadd.f32 %v2067_v30, %v320_v46 }
 0x333   :  { %v323_v47 = vpop.f32.mrf.mxu1 }
 0x334   :  { %v2372_v28 = vadd.f32 %v2067_v30, %v323_v47 }
 0x336   :  { %330 = vrot.lane.b32.xlu2 %v2372_v28, %s2214_s7  ;;  %v2394_v62 = vpack.i.bf16 %v321_v36, %v2372_v28 }
 0x33e   :  { %328 = vrot.lane.b32.xlu2 %v321_v36, %s2214_s7 }
 0x390   :  { %v331_v48 = vpop.permute.xlu2 %330 }
 0x391   :  { %1931 = vmatpush.xpose.msk.msrb.mxu2 %vm25_vm0, %v331_v48 }
 0x398   :  { %v329_v37 = vpop.permute.xlu2 %328 }
 0x399   :  { %1932 = vmatpush.xpose.msk.msrb.mxu2 %vm25_vm0, %v329_v37 }
 0x39c   :  { %1933 = vmatmul.msk.f32.vlgmr.msrb.gmra.mxu2 %vm25_vm0, %v321_v36 }
 0x3a4   :  { %1934 = vmatmul.msk.f32.gmra.mxu2 %vm25_vm0, %v2372_v28 }
 0x41f   :  { %v357_v51 = vpop.f32.mrf.mxu2 }
 0x420   :  { %v363_v52 = vmul.f32 0.35355338, %v357_v51 }
 0x422   :  { %v365_v54 = vadd.f32 %v363_v52, %v2385_v53 }
 0x424   :  { %v367_v55 = vsel %vm163_vm1, %v365_v54, -inf }
 0x425   :  { %368 = vmax.xlane.f32.xlu0 %v367_v55 }
 0x427   :  { %v360_v56 = vpop.f32.mrf.mxu2 }
 0x428   :  { %v364_v57 = vmul.f32 0.35355338, %v360_v56 }
 0x42a   :  { %v366_v60 = vadd.f32 %v364_v57, %v2389_v58 }
 0x42c   :  { %v370_v61 = vsel %vm163_vm1, %v366_v60, -inf }
 0x42d   :  { %371 = vmax.xlane.f32.xlu1 %v370_v61 }
 0x439   :  { %2023 = vrot.lane.b32.xlu0 %v2394_v62, %s2215_s2 }
 0x441   :  { %429 = vrot.lane.b32.xlu0 %v321_v36, %s2216_s10 }
 0x449   :  { %425 = vrot.lane.b32.xlu0 %v321_v36, %s2217_s11 }
 0x451   :  { %722 = vrot.lane.b32.xlu0 %v2372_v28, %s2218_s12 }
 0x459   :  { %720 = vrot.lane.b32.xlu0 %v321_v36, %s2218_s12 }
 0x461   :  { %716 = vrot.lane.b32.xlu0 %v321_v36, %s2219_s13 }
 0x498   :  { %v369_v63 = vpop.xlane.xlu0 %368 }
 0x499   :  { %v373_v0 = vsub.f32 %v365_v54, %v369_v63 }
 0x49b   :  { %v375_v1 = vmul.f32 1.442695, %v373_v0 }
 0x49d   :  { %2096 = vpow2.f32 %v375_v1 }
 0x4a0   :  { %v372_v2 = vpop.xlane.xlu1 %371 }
 0x4a1   :  { %v374_v3 = vsub.f32 %v366_v60, %v372_v2 }
 0x4a3   :  { %v2097_v4 = vpop.eup %2096  ;;  %v377_v5 = vmul.f32 1.442695, %v374_v3 }
 0x4a4   :  { %v379_v6 = vsel %vm163_vm1, %v2097_v4, 0.0 }
 0x4a5   :  { %2098 = vpow2.f32 %v377_v5  ;;  %380 = vadd.xlane.f32.xlu2 %v379_v6 }
 0x4ab   :  { %v2099_v7 = vpop.eup %2098  ;;  %v2024_v8 = vpop.permute.xlu0 %2023 }
 0x4ac   :  { %v382_v9 = vsel %vm163_vm1, %v2099_v7, 0.0  ;;  %v2025_v10 = vunpack.i.l.bf16 %v2024_v8  ;;  %v2026_v11 = vunpack.i.h.bf16 %v2024_v8 }
 0x4ad   :  { %383 = vadd.xlane.f32.xlu1 %v382_v9 }
 0x4ae   :  { %415 = vmatpush.msrb.mxu3 %v2025_v10 }
 0x4b0   :  { %416 = vmatpush.msrb.mxu3 %v2026_v11 }
 0x4b2   :  { %576 = vmatpush.msra.mxu3 %v424_v12 }
 0x4b3   :  { %v430_v13 = vpop.permute.xlu0 %429 }
 0x4bb   :  { %v426_v14 = vpop.permute.xlu0 %425 }
 0x4bd   :  { %590 = vrot.lane.b32.xlu2 %v2372_v28, %s2220_s14 }
 0x4c3   :  { %v723_v16 = vpop.permute.xlu0 %722 }
 0x4c5   :  { %718 = vrot.lane.b32.xlu2 %v2372_v28, %s2219_s13 }
 0x4c6   :  { %431 = vrot.lane.b32.xlu1 %v2372_v28, %s2216_s10 }
 0x4cb   :  { %v721_v20 = vpop.permute.xlu0 %720 }
 0x4ce   :  { %427 = vrot.lane.b32.xlu1 %v2372_v28, %s2217_s11 }
 0x4d3   :  { %v717_v33 = vpop.permute.xlu0 %716 }
 0x4d6   :  { %588 = vrot.lane.b32.xlu1 %v321_v36, %s2220_s14 }
 0x4de   :  { %584 = vrot.lane.b32.xlu1 %v321_v36, %s2221_s15 }
 0x4e6   :  { %586 = vrot.lane.b32.xlu1 %v2372_v28, %s2221_s15 }
 0x518   :  { %v381_v15 = vpop.xlane.xlu2 %380 }
 0x519   :  { %2100 = vrcp.f32 %v381_v15 }
 0x51f   :  { %v2101_v17 = vpop.eup %2100 }
 0x520   :  { %v384_v18 = vpop.xlane.xlu1 %383  ;;  %v387_v19 = vmul.f32 %v2101_v17, %v2097_v4  ;;  %v591_v24 = vpop.permute.xlu2 %590 }
 0x521   :  { %2102 = vrcp.f32 %v384_v18 }
 0x522   :  { %1935 = vmatmul.msk.f32.vlgmr.msrb.gmra.mxu3 %vm163_vm1, %v387_v19 }
 0x523   :  { %1955 = vmatpush.xpose.msk.msrb.mxu3 %vm25_vm0, %v723_v16 }
 0x527   :  { %v2103_v21 = vpop.eup %2102  ;;  %1956 = vmatpush.xpose.msk.msrb.mxu3 %vm25_vm0, %v721_v20 }
 0x528   :  { %v388_v22 = vmul.f32 %v2103_v21, %v2099_v7  ;;  %v719_v35 = vpop.permute.xlu2 %718 }
 0x52a   :  { %1936 = vmatmul.msk.f32.gmra.mxu3 %vm163_vm1, %v388_v22 }
 0x538   :  { %v432_v23 = vpop.permute.xlu1 %431 }
 0x539   :  { %1937 = vmatpush.xpose.msk.msra.mxu0 %vm25_vm0, %v432_v23 }
 0x53d   :  { %1938 = vmatpush.xpose.msk.msra.mxu0 %vm25_vm0, %v430_v13 }
 0x540   :  { %1939 = vmatmul.msk.f32.vlgmr.msra.gmra.mxu0 %vm25_vm0, %v426_v14  ;;  %v428_v25 = vpop.permute.xlu1 %427 }
 0x541   :  { %1947 = vmatpush.xpose.msk.msrb.mxu0 %vm25_vm0, %v591_v24 }
 0x548   :  { %1940 = vmatmul.msk.f32.gmra.mxu0 %vm25_vm0, %v428_v25  ;;  %v589_v26 = vpop.permute.xlu1 %588 }
 0x549   :  { %1948 = vmatpush.xpose.msk.msrb.mxu0 %vm25_vm0, %v589_v26 }
 0x550   :  { %v585_v27 = vpop.permute.xlu1 %584 }
 0x551   :  { %1949 = vmatmul.msk.f32.vlgmr.msrb.gmra.mxu0 %vm25_vm0, %v585_v27 }
 0x558   :  { %v587_v29 = vpop.permute.xlu1 %586 }
 0x559   :  { %1950 = vmatmul.msk.f32.gmra.mxu0 %vm25_vm0, %v587_v29 }
 0x5a5   :  { %v418_v31 = vpop.f32.mrf.mxu3 }
 0x5a6   :  { %1945 = vmatmul.msk.f32.vlgmr.msra.gmra.mxu3 %vm25_vm0, %v418_v31 }
 0x5ad   :  { %v421_v32 = vpop.f32.mrf.mxu3 }
 0x5ae   :  { %1946 = vmatmul.msk.f32.gmra.mxu3 %vm25_vm0, %v421_v32 }
 0x5b6   :  { %1957 = vmatmul.msk.f32.vlgmr.msrb.gmra.mxu3 %vm25_vm0, %v717_v33 }
 0x5bd   :  { %v458_v39 = vpop.f32.mrf.mxu0 }
 0x5be   :  { %v464_v40 = vmul.f32 0.35355338, %v458_v39  ;;  %1958 = vmatmul.msk.f32.gmra.mxu3 %vm25_vm0, %v719_v35 }
 0x5c0   :  { %v466_v41 = vadd.f32 %v464_v40, %v2385_v53 }
 0x5c2   :  { %v468_v43 = vsel %vm163_vm1, %v466_v41, -inf }
 0x5c3   :  { %469 = vmax.xlane.f32.xlu0 %v468_v43 }
 0x5c5   :  { %v461_v44 = vpop.f32.mrf.mxu0 }
 0x5c6   :  { %v465_v46 = vmul.f32 0.35355338, %v461_v44 }
 0x5c8   :  { %v467_v30 = vadd.f32 %v465_v46, %v2389_v58 }
 0x5ca   :  { %v471_v47 = vsel %vm163_vm1, %v467_v30, -inf }
 0x5cb   :  { %472 = vmax.xlane.f32.xlu1 %v471_v47 }
 0x5ce   :  { %v617_v28 = vpop.f32.mrf.mxu0 }
 0x5cf   :  { %v623_v36 = vmul.f32 0.35355338, %v617_v28 }
 0x5d1   :  { %v625_v48 = vadd.f32 %v623_v36, %v2385_v53 }
 0x5d3   :  { %v627_v37 = vsel %vm163_vm1, %v625_v48, -inf }
 0x5d4   :  { %628 = vmax.xlane.f32.xlu2 %v627_v37 }
 0x5d6   :  { %v620_v38 = vpop.f32.mrf.mxu0 }
 0x5d7   :  { %v624_v49 = vmul.f32 0.35355338, %v620_v38 }
 0x5d9   :  { %v626_v50 = vadd.f32 %v624_v49, %v2389_v58 }
 0x5db   :  { %v630_v51 = vsel %vm163_vm1, %v626_v50, -inf }
 0x5dc   :  { %631 = vmax.xlane.f32.xlu0 %v630_v51 }
 0x629   :  { %v2445_v52 = vpop.f32.mrf.mxu3 }
 0x631   :  { %v2447_v54 = vpop.f32.mrf.mxu3 }
 0x636   :  { %v470_v55 = vpop.xlane.xlu0 %469 }
 0x637   :  { %v474_v56 = vsub.f32 %v466_v41, %v470_v55 }
 0x639   :  { %v476_v57 = vmul.f32 1.442695, %v474_v56  ;;  %v749_v60 = vpop.f32.mrf.mxu3 }
 0x63a   :  { %v755_v61 = vmul.f32 0.35355338, %v749_v60  ;;  %v525_v60 = vld [vmem:[%s2812_s4 + $0xe0] sm:$0xff] }
 0x63b   :  { %2104 = vpow2.f32 %v476_v57  ;;  %547 = vmatpush.msra.mxu2 %v525_v60 }
 0x63c   :  { %v757_v63 = vadd.f32 %v755_v61, %v2385_v53 }
 0x63e   :  { %v473_v0 = vpop.xlane.xlu1 %472  ;;  %v759_v1 = vsel %vm163_vm1, %v757_v63, -inf }
 0x63f   :  { %v475_v2 = vsub.f32 %v467_v30, %v473_v0  ;;  %760 = vmax.xlane.f32.xlu2 %v759_v1 }
 0x641   :  { %v2105_v3 = vpop.eup %2104  ;;  %v478_v4 = vmul.f32 1.442695, %v475_v2  ;;  %v752_v5 = vpop.f32.mrf.mxu3  ;;  %v684_v2 = vld [vmem:[%s2812_s4 + $0xe8] sm:$0xff] }
 0x642   :  { %v756_v6 = vmul.f32 0.35355338, %v752_v5  ;;  %v480_v7 = vsel %vm163_vm1, %v2105_v3, 0.0  ;;  %706 = vmatpush.msrb.mxu2 %v684_v2 }
 0x643   :  { %481 = vadd.xlane.f32.xlu0 %v480_v7  ;;  %2106 = vpow2.f32 %v478_v4 }
 0x644   :  { %v758_v8 = vadd.f32 %v756_v6, %v2389_v58  ;;  %v816_v6 = vld [vmem:[%s2812_s4 + $0xf0] sm:$0xff] }
 0x646   :  { %v762_v9 = vsel %vm163_vm1, %v758_v8, -inf }
 0x647   :  { %763 = vmax.xlane.f32.xlu1 %v762_v9  ;;  %v629_v10 = vpop.xlane.xlu2 %628 }
 0x648   :  { %v633_v11 = vsub.f32 %v625_v48, %v629_v10 }
 0x649   :  { %v2107_v13 = vpop.eup %2106 }
 0x64a   :  { %v635_v12 = vmul.f32 1.442695, %v633_v11  ;;  %v483_v14 = vsel %vm163_vm1, %v2107_v13, 0.0 }
 0x64c   :  { %2108 = vpow2.f32 %v635_v12 }
 0x64f   :  { %v632_v15 = vpop.xlane.xlu0 %631  ;;  %484 = vadd.xlane.f32.xlu1 %v483_v14 }
 0x650   :  { %v634_v16 = vsub.f32 %v626_v50, %v632_v15 }
 0x652   :  { %v2109_v17 = vpop.eup %2108  ;;  %v637_v18 = vmul.f32 1.442695, %v634_v16 }
 0x653   :  { %v639_v19 = vsel %vm163_vm1, %v2109_v17, 0.0 }
 0x654   :  { %2110 = vpow2.f32 %v637_v18  ;;  %640 = vadd.xlane.f32.xlu0 %v639_v19 }
 0x657   :  { %2028 = vrot.lane.b32.xlu2 %v2394_v62, %s2222_s17 }
 0x65a   :  { %v2111_v20 = vpop.eup %2110 }
 0x65b   :  { %v642_v21 = vsel %vm163_vm1, %v2111_v20, 0.0 }
 0x65c   :  { %643 = vadd.xlane.f32.xlu0 %v642_v21 }
 0x65f   :  { %2038 = vrot.lane.b32.xlu2 %v2394_v62, %s2223_s18 }
 0x668   :  { %2033 = vrot.lane.b32.xlu1 %v2394_v62, %s2224_s19 }
 0x6b2   :  { %v761_v22 = vpop.xlane.xlu2 %760 }
 0x6b3   :  { %v765_v23 = vsub.f32 %v757_v63, %v761_v22 }
 0x6b5   :  { %v767_v24 = vmul.f32 1.442695, %v765_v23 }
 0x6b6   :  { %v482_v25 = vpop.xlane.xlu0 %481 }
 0x6b7   :  { %2112 = vpow2.f32 %v767_v24 }
 0x6b8   :  { %2114 = vrcp.f32 %v482_v25 }
 0x6ba   :  { %v2029_v26 = vpop.permute.xlu2 %2028  ;;  %v764_v27 = vpop.xlane.xlu1 %763 }
 0x6bb   :  { %v2030_v29 = vunpack.i.l.bf16 %v2029_v26  ;;  %v766_v31 = vsub.f32 %v758_v8, %v764_v27  ;;  %v2031_v33 = vunpack.i.h.bf16 %v2029_v26 }
 0x6bd   :  { %v2113_v32 = vpop.eup %2112  ;;  %v769_v35 = vmul.f32 1.442695, %v766_v31  ;;  %516 = vmatpush.msra.mxu1 %v2030_v29 }
 0x6be   :  { %v2115_v39 = vpop.eup %2114  ;;  %v771_v40 = vsel %vm163_vm1, %v2113_v32, 0.0 }
 0x6bf   :  { %v488_v41 = vmul.f32 %v2115_v39, %v2105_v3  ;;  %2116 = vpow2.f32 %v769_v35  ;;  %517 = vmatpush.msra.mxu1 %v2031_v33  ;;  %772 = vadd.xlane.f32.xlu0 %v771_v40 }
 0x6c1   :  { %1941 = vmatmul.msk.f32.vlgmr.msra.gmra.mxu1 %vm163_vm1, %v488_v41 }
 0x6c2   :  { %v2039_v62 = vpop.permute.xlu2 %2038  ;;  %v485_v43 = vpop.xlane.xlu1 %484 }
 0x6c3   :  { %v2040_v44 = vunpack.i.l.bf16 %v2039_v62  ;;  %2118 = vrcp.f32 %v485_v43  ;;  %v2041_v30 = vunpack.i.h.bf16 %v2039_v62 }
 0x6c5   :  { %v2117_v46 = vpop.eup %2116  ;;  %807 = vmatpush.msra.mxu0 %v2040_v44  ;;  %v908_v44 = vld [vmem:[%s2812_s4 + $0x108] sm:$0xff] }
 0x6c6   :  { %v774_v47 = vsel %vm163_vm1, %v2117_v46, 0.0 }
 0x6c7   :  { %808 = vmatpush.msra.mxu0 %v2041_v30  ;;  %775 = vadd.xlane.f32.xlu0 %v774_v47  ;;  %v641_v48 = vpop.xlane.xlu0 %640  ;;  %v906_v30 = vld [vmem:[%s2812_s4 + $0xf8] sm:$0xff] }
 0x6c8   :  { %2120 = vrcp.f32 %v641_v48 }
 0x6c9   :  { %v2119_v28 = vpop.eup %2118 }
 0x6ca   :  { %v489_v36 = vmul.f32 %v2119_v28, %v2107_v13 }
 0x6cc   :  { %1942 = vmatmul.msk.f32.gmra.mxu1 %vm163_vm1, %v489_v36 }
 0x6ce   :  { %v2121_v49 = vpop.eup %2120 }
 0x6cf   :  { %v644_v37 = vpop.xlane.xlu0 %643  ;;  %v647_v55 = vmul.f32 %v2121_v49, %v2109_v17  ;;  %v2069_v17 = vld [vmem:[%s2811_s3 + $0x8] ss:$0 sm:$0xff] }
 0x6d0   :  { %2122 = vrcp.f32 %v644_v37 }
 0x6d6   :  { %v2123_v56 = vpop.eup %2122 }
 0x6d7   :  { %v648_v57 = vmul.f32 %v2123_v56, %v2111_v20 }
 0x6da   :  { %v2034_v38 = vpop.permute.xlu1 %2033 }
 0x6db   :  { %v2035_v50 = vunpack.i.l.bf16 %v2034_v38  ;;  %v2036_v51 = vunpack.i.h.bf16 %v2034_v38 }
 0x6dd   :  { %675 = vmatpush.msrb.mxu1 %v2035_v50 }
 0x6df   :  { %676 = vmatpush.msrb.mxu1 %v2036_v51 }
 0x6e0   :  { %1951 = vmatmul.msk.f32.vlgmr.msrb.gmra.mxu1 %vm163_vm1, %v647_v55 }
 0x6e1   :  { %838 = vmatpush.msra.mxu1 %v816_v6 }
 0x6e8   :  { %1952 = vmatmul.msk.f32.gmra.mxu1 %vm163_vm1, %v648_v57 }
 0x732   :  { %v773_v61 = vpop.xlane.xlu0 %772 }
 0x733   :  { %2124 = vrcp.f32 %v773_v61 }
 0x739   :  { %v2125_v63 = vpop.eup %2124 }
 0x73a   :  { %v779_v0 = vmul.f32 %v2125_v63, %v2113_v32  ;;  %v776_v1 = vpop.xlane.xlu0 %775  ;;  %v2070_v63 = vld [vmem:[%s2811_s3 + $0x9] ss:$0 sm:$0xff] }
 0x73b   :  { %2126 = vrcp.f32 %v776_v1 }
 0x73c   :  { %1959 = vmatmul.msk.f32.vlgmr.msra.gmra.mxu0 %vm163_vm1, %v779_v0 }
 0x73e   :  { %v519_v3 = vpop.f32.mrf.mxu1 }
 0x73f   :  { %1943 = vmatmul.msk.f32.vlgmr.msra.gmra.mxu2 %vm25_vm0, %v519_v3  ;;  %v2071_v3 = vld [vmem:[%s2811_s3 + $0xa] ss:$0 sm:$0xff] }
 0x741   :  { %v2127_v4 = vpop.eup %2126 }
 0x742   :  { %v780_v5 = vmul.f32 %v2127_v4, %v2117_v46  ;;  %v907_v46 = vld [vmem:[%s2812_s4 + $0x100] sm:$0xff] }
 0x744   :  { %1960 = vmatmul.msk.f32.gmra.mxu0 %vm163_vm1, %v780_v5 }
 0x749   :  { %v522_v7 = vpop.f32.mrf.mxu1 }
 0x74a   :  { %1944 = vmatmul.msk.f32.gmra.mxu2 %vm25_vm0, %v522_v7 }
 0x75d   :  { %v678_v8 = vpop.f32.mrf.mxu1 }
 0x75e   :  { %1953 = vmatmul.msk.f32.vlgmr.msrb.gmra.mxu2 %vm25_vm0, %v678_v8 }
 0x765   :  { %v681_v9 = vpop.f32.mrf.mxu1 }
 0x766   :  { %1954 = vmatmul.msk.f32.gmra.mxu2 %vm25_vm0, %v681_v9 }
 0x7b9   :  { %v810_v10 = vpop.f32.mrf.mxu0 }
 0x7ba   :  { %1961 = vmatmul.msk.f32.vlgmr.msra.gmra.mxu1 %vm25_vm0, %v810_v10 }
 0x7c1   :  { %v813_v11 = vpop.f32.mrf.mxu0 }
 0x7c2   :  { %1962 = vmatmul.msk.f32.gmra.mxu1 %vm25_vm0, %v813_v11  ;;  %v549_v12 = vpop.f32.mrf.mxu2 }
 0x7c3   :  { %v579_v15 = vadd.f32 %v2445_v52, %v549_v12 }
 0x7cd   :  { %v552_v13 = vpop.f32.mrf.mxu2 }
 0x7ce   :  { %v582_v22 = vadd.f32 %v2447_v54, %v552_v13  ;;  %v966_v13 = vld [vmem:[%s2812_s4 + $0x150] sm:$0xff] }
 0x7cf   :  { %984 = vmatpush.msra.mxu3 %v966_v13 }
 0x7e1   :  { %v708_v14 = vpop.f32.mrf.mxu2 }
 0x7e2   :  { %v714_v16 = vadd.f32 %v708_v14, %v579_v15  ;;  %v965_v14 = vld [vmem:[%s2812_s4 + $0x148] sm:$0xff]  ;;  %v964_v15 = vld [vmem:[%s2812_s4 + $0x140] sm:$0xff] }
 0x7e3   :  { %985 = vmatpush.msra.mxu3 %v965_v14 }
 0x7e5   :  { %986 = vmatpush.msra.mxu3 %v964_v15 }
 0x7e9   :  { %v711_v21 = vpop.f32.mrf.mxu2 }
 0x7ea   :  { %v715_v24 = vadd.f32 %v711_v21, %v582_v22  ;;  %v2072_v21 = vld [vmem:[%s2811_s3 + $0xb] ss:$0 sm:$0xff] }
 0x837   :  { %v840_v18 = vpop.f32.mrf.mxu1 }
 0x838   :  { %v846_v19 = vadd.f32 %v840_v18, %v714_v16  ;;  %v963_v16 = vld [vmem:[%s2812_s4 + $0x138] sm:$0xff]  ;;  %v961_v18 = vld [vmem:[%s2812_s4 + $0x128] sm:$0xff] }
 0x839   :  { %987 = vmatpush.msra.mxu3 %v963_v16 }
 0x83a   :  { %v850_v20 = vadd.f32 %v2069_v17, %v846_v19  ;;  %v960_v19 = vld [vmem:[%s2812_s4 + $0x120] sm:$0xff] }
 0x83c   :  { %v852_v23 = vadd.f32 %v850_v20, %v2349_v34  ;;  %v959_v20 = vld [vmem:[%s2812_s4 + $0x118] sm:$0xff] }
 0x83e   :  { %v856_v25 = vsel %vm75_vm6, %v852_v23, 0.0 }
 0x83f   :  { %857 = vadd.xlane.f32.xlu2 %v856_v25  ;;  %v843_v26 = vpop.f32.mrf.mxu1 }
 0x840   :  { %v847_v27 = vadd.f32 %v843_v26, %v715_v24 }
 0x842   :  { %v851_v52 = vadd.f32 %v2069_v17, %v847_v27  ;;  %v962_v17 = vld [vmem:[%s2812_s4 + $0x130] sm:$0xff] }
 0x843   :  { %988 = vmatpush.msra.mxu3 %v962_v17 }
 0x844   :  { %v853_v29 = vadd.f32 %v851_v52, %v2353_v42  ;;  %v909_v42 = vld [vmem:[%s2812_s4 + $0x110] sm:$0xff] }
 0x845   :  { %930 = vmatpush.msra.mxu2 %v909_v42  ;;  %989 = vmatpush.msra.mxu3 %v961_v18 }
 0x846   :  { %v859_v31 = vsel %vm75_vm6, %v853_v29, 0.0 }
 0x847   :  { %860 = vadd.xlane.f32.xlu1 %v859_v31  ;;  %931 = vmatpush.msra.mxu2 %v908_v44 }
 0x848   :  { %990 = vmatpush.msra.mxu3 %v960_v19 }
 0x849   :  { %932 = vmatpush.msra.mxu2 %v907_v46 }
 0x84a   :  { %991 = vmatpush.msra.mxu3 %v959_v20 }
 0x84b   :  { %933 = vmatpush.msra.mxu2 %v906_v30  ;;  %v2073_v30 = vld [vmem:[%s2811_s3 + $0xc] ss:$0 sm:$0xff] }
 0x8b2   :  { %v858_v32 = vpop.xlane.xlu2 %857 }
 0x8b3   :  { %v862_v33 = vmul.f32 %v858_v32, %v2323_v59 }
 0x8b5   :  { %v864_v35 = vsub.f32 %v852_v23, %v862_v33 }
 0x8b7   :  { %v866_v39 = vmul.f32 %v864_v35, %v864_v35 }
 0x8b9   :  { %v868_v54 = vsel %vm75_vm6, %v866_v39, 0.0 }
 0x8ba   :  { %869 = vadd.xlane.f32.xlu0 %v868_v54  ;;  %v861_v34 = vpop.xlane.xlu1 %860 }
 0x8bb   :  { %v863_v40 = vmul.f32 %v861_v34, %v2323_v59 }
 0x8bd   :  { %v865_v41 = vsub.f32 %v853_v29, %v863_v40 }
 0x8bf   :  { %v867_v62 = vmul.f32 %v865_v41, %v865_v41 }
 0x8c1   :  { %v871_v43 = vsel %vm75_vm6, %v867_v62, 0.0 }
 0x8c2   :  { %872 = vadd.xlane.f32.xlu0 %v871_v43 }
 0x92d   :  { %v870_v47 = vpop.xlane.xlu0 %869 }
 0x92e   :  { %v874_v28 = vmul.f32 %v870_v47, %v2323_v59 }
 0x930   :  { %v876_v36 = vadd.f32 1e-12, %v874_v28 }
 0x932   :  { %2128 = vrsqrt.f32 %v876_v36  ;;  %vm884_vm15 = vweird.f32 %v876_v36 }
 0x935   :  { %v873_v48 = vpop.xlane.xlu0 %872 }
 0x936   :  { %v875_v37 = vmul.f32 %v873_v48, %v2323_v59 }
 0x938   :  { %v2129_v38 = vpop.eup %2128  ;;  %v877_v49 = vadd.f32 1e-12, %v875_v37 }
 0x939   :  { %v879_v50 = vmul.f32 %v2129_v38, %v876_v36  ;;  %vm885_vm14 = vweird.f32 %v2129_v38 }
 0x93a   :  { %2130 = vrsqrt.f32 %v877_v49  ;;  %vm886_vm2 = vmor %vm884_vm15, %vm885_vm14  ;;  %vm894_vm4 = vweird.f32 %v877_v49 }
 0x93b   :  { %v880_v51 = vmul.f32 %v2129_v38, %v879_v50 }
 0x93d   :  { %v881_v55 = vmul.f32 0.5, %v880_v51 }
 0x93f   :  { %v882_v56 = vsub.f32 1.5, %v881_v55 }
 0x940   :  { %v2131_v57 = vpop.eup %2130 }
 0x941   :  { %v883_v60 = vmul.f32 %v2129_v38, %v882_v56  ;;  %v889_v61 = vmul.f32 %v2131_v57, %v877_v49  ;;  %vm895_vm3 = vweird.f32 %v2131_v57 }
 0x942   :  { %vm896_vm5 = vmor %vm894_vm4, %vm895_vm3 }
 0x943   :  { %v887_v0 = vsel %vm886_vm2, %v2129_v38, %v883_v60  ;;  %v890_v1 = vmul.f32 %v2131_v57, %v889_v61 }
 0x944   :  { %v898_v2 = vmul.f32 %v887_v0, %v864_v35 }
 0x945   :  { %v891_v4 = vmul.f32 0.5, %v890_v1 }
 0x946   :  { %v901_v5 = vmul.f32 %v2070_v63, %v898_v2 }
 0x947   :  { %v892_v6 = vsub.f32 1.5, %v891_v4  ;;  %v1055_v4 = vld [vmem:[%s2812_s4 + $0x168] sm:$0xff] }
 0x948   :  { %v904_v7 = vadd.f32 %v2071_v3, %v901_v5  ;;  %v1054_v5 = vld [vmem:[%s2812_s4 + $0x160] sm:$0xff] }
 0x949   :  { %v893_v8 = vmul.f32 %v2131_v57, %v892_v6  ;;  %v1053_v6 = vld [vmem:[%s2812_s4 + $0x158] sm:$0xff] }
 0x94a   :  { %1963 = vmatmul.msk.f32.vlgmr.msra.gmra.mxu2 %vm75_vm6, %v904_v7 }
 0x94b   :  { %v897_v9 = vsel %vm896_vm5, %v2131_v57, %v893_v8 }
 0x94c   :  { %v899_v10 = vmul.f32 %v897_v9, %v865_v41 }
 0x94e   :  { %v902_v11 = vmul.f32 %v2070_v63, %v899_v10 }
 0x950   :  { %v905_v12 = vadd.f32 %v2071_v3, %v902_v11  ;;  %v1056_v3 = vld [vmem:[%s2812_s4 + $0x170] sm:$0xff] }
 0x951   :  { %1077 = vmatpush.msrb.mxu0 %v1056_v3 }
 0x952   :  { %1964 = vmatmul.msk.f32.gmra.mxu2 %vm75_vm6, %v905_v12 }
 0x953   :  { %1078 = vmatpush.msrb.mxu0 %v1055_v4 }
 0x955   :  { %1079 = vmatpush.msrb.mxu0 %v1054_v5 }
 0x957   :  { %1080 = vmatpush.msrb.mxu0 %v1053_v6 }
 0x9cd   :  { %v935_v22 = vpop.f32.mrf.mxu2 }
 0x9ce   :  { %v936_v23 = vadd.f32 %v2072_v21, %v935_v22 }
 0x9d0   :  { %v943_v24 = vmul.f32 0.044715, %v936_v23  ;;  %v941_v40 = vmul.f32 0.5, %v936_v23 }
 0x9d2   :  { %v945_v25 = vmul.f32 %v943_v24, %v936_v23 }
 0x9d4   :  { %v947_v26 = vmul.f32 %v945_v25, %v936_v23  ;;  %v2075_v25 = vld [vmem:[%s2811_s3 + $0xe] ss:$0 sm:$0xff] }
 0x9d5   :  { %v938_v27 = vpop.f32.mrf.mxu2 }
 0x9d6   :  { %v949_v52 = vadd.f32 %v947_v26, %v936_v23  ;;  %v939_v29 = vadd.f32 %v2072_v21, %v938_v27  ;;  %v2074_v21 = vld [vmem:[%s2811_s3 + $0xd] ss:$0 sm:$0xff] }
 0x9d8   :  { %v951_v31 = vmul.f32 0.7978846, %v949_v52  ;;  %v944_v32 = vmul.f32 0.044715, %v939_v29  ;;  %v942_v42 = vmul.f32 0.5, %v939_v29 }
 0x9da   :  { %2132 = vtanh.f32 %v951_v31  ;;  %v946_v33 = vmul.f32 %v944_v32, %v939_v29 }
 0x9dc   :  { %v948_v35 = vmul.f32 %v946_v33, %v939_v29 }
 0x9de   :  { %v950_v39 = vadd.f32 %v948_v35, %v939_v29 }
 0x9e0   :  { %v2133_v54 = vpop.eup %2132  ;;  %v952_v34 = vmul.f32 0.7978846, %v950_v39 }
 0x9e1   :  { %v955_v41 = vadd.f32 1.0, %v2133_v54  ;;  %v2076_v54 = vld [vmem:[%s2811_s3 + $0xf] ss:$0 sm:$0xff] }
 0x9e2   :  { %2134 = vtanh.f32 %v952_v34 }
 0x9e3   :  { %v957_v62 = vmul.f32 %v955_v41, %v941_v40 }
 0x9e5   :  { %1965 = vmatmul.msk.f32.vlgmr.msra.gmra.mxu3 %vm969_vm7, %v957_v62 }
 0x9e8   :  { %v2135_v43 = vpop.eup %2134 }
 0x9e9   :  { %v956_v44 = vadd.f32 1.0, %v2135_v43 }
 0x9eb   :  { %v958_v46 = vmul.f32 %v956_v44, %v942_v42 }
 0x9ed   :  { %1966 = vmatmul.msk.f32.gmra.mxu3 %vm969_vm7, %v958_v46 }
 0xa68   :  { %v993_v47 = vpop.f32.mrf.mxu3 }
 0xa69   :  { %v994_v28 = vadd.f32 %v2073_v30, %v993_v47 }
 0xa6b   :  { %v999_v36 = vadd.f32 %v994_v28, %v904_v7 }
 0xa6d   :  { %v1003_v48 = vsel %vm75_vm6, %v999_v36, 0.0 }
 0xa6e   :  { %1004 = vadd.xlane.f32.xlu0 %v1003_v48 }
 0xa70   :  { %v996_v37 = vpop.f32.mrf.mxu3 }
 0xa71   :  { %v997_v38 = vadd.f32 %v2073_v30, %v996_v37 }
 0xa73   :  { %v1000_v49 = vadd.f32 %v997_v38, %v905_v12 }
 0xa75   :  { %v1006_v50 = vsel %vm75_vm6, %v1000_v49, 0.0 }
 0xa76   :  { %1007 = vadd.xlane.f32.xlu0 %v1006_v50 }
 0xae1   :  { %v1005_v51 = vpop.xlane.xlu0 %1004 }
 0xae2   :  { %v1009_v55 = vmul.f32 %v1005_v51, %v2323_v59 }
 0xae4   :  { %v1011_v56 = vsub.f32 %v999_v36, %v1009_v55 }
 0xae6   :  { %v1013_v57 = vmul.f32 %v1011_v56, %v1011_v56 }
 0xae8   :  { %v1015_v60 = vsel %vm75_vm6, %v1013_v57, 0.0 }
 0xae9   :  { %1016 = vadd.xlane.f32.xlu0 %v1015_v60  ;;  %v1008_v61 = vpop.xlane.xlu0 %1007 }
 0xaea   :  { %v1010_v63 = vmul.f32 %v1008_v61, %v2323_v59 }
 0xaec   :  { %v1012_v0 = vsub.f32 %v1000_v49, %v1010_v63 }
 0xaee   :  { %v1014_v1 = vmul.f32 %v1012_v0, %v1012_v0 }
 0xaf0   :  { %v1018_v2 = vsel %vm75_vm6, %v1014_v1, 0.0 }
 0xaf1   :  { %1019 = vadd.xlane.f32.xlu2 %v1018_v2 }
 0xb5c   :  { %v1017_v7 = vpop.xlane.xlu0 %1016 }
 0xb5d   :  { %v1021_v8 = vmul.f32 %v1017_v7, %v2323_v59 }
 0xb5f   :  { %v1023_v9 = vadd.f32 1e-12, %v1021_v8 }
 0xb61   :  { %2136 = vrsqrt.f32 %v1023_v9  ;;  %vm1031_vm9 = vweird.f32 %v1023_v9 }
 0xb64   :  { %v1020_v10 = vpop.xlane.xlu2 %1019 }
 0xb65   :  { %v1022_v11 = vmul.f32 %v1020_v10, %v2323_v59  ;;  %v1186_v10 = vld [vmem:[%s2812_s4 + $0x178] sm:$0xff] }
 0xb67   :  { %v2137_v12 = vpop.eup %2136  ;;  %v1024_v13 = vadd.f32 1e-12, %v1022_v11 }
 0xb68   :  { %v1026_v14 = vmul.f32 %v2137_v12, %v1023_v9  ;;  %vm1032_vm8 = vweird.f32 %v2137_v12 }
 0xb69   :  { %2138 = vrsqrt.f32 %v1024_v13  ;;  %vm1033_vm12 = vmor %vm1031_vm9, %vm1032_vm8  ;;  %vm1041_vm10 = vweird.f32 %v1024_v13 }
 0xb6a   :  { %v1027_v15 = vmul.f32 %v2137_v12, %v1026_v14 }
 0xb6c   :  { %v1028_v16 = vmul.f32 0.5, %v1027_v15 }
 0xb6e   :  { %v1029_v17 = vsub.f32 1.5, %v1028_v16 }
 0xb6f   :  { %v2139_v18 = vpop.eup %2138 }
 0xb70   :  { %v1030_v19 = vmul.f32 %v2137_v12, %v1029_v17  ;;  %v1036_v20 = vmul.f32 %v2139_v18, %v1024_v13  ;;  %vm1042_vm13 = vweird.f32 %v2139_v18 }
 0xb71   :  { %vm1043_vm11 = vmor %vm1041_vm10, %vm1042_vm13 }
 0xb72   :  { %v1034_v22 = vsel %vm1033_vm12, %v2137_v12, %v1030_v19  ;;  %v1037_v23 = vmul.f32 %v2139_v18, %v1036_v20 }
 0xb73   :  { %v1045_v24 = vmul.f32 %v1034_v22, %v1011_v56 }
 0xb74   :  { %v1038_v26 = vmul.f32 0.5, %v1037_v23 }
 0xb75   :  { %v1048_v27 = vmul.f32 %v2074_v21, %v1045_v24 }
 0xb76   :  { %v1039_v52 = vsub.f32 1.5, %v1038_v26 }
 0xb77   :  { %v2579_v29 = vadd.f32 %v2075_v25, %v1048_v27 }
 0xb78   :  { %v1040_v31 = vmul.f32 %v2139_v18, %v1039_v52 }
 0xb79   :  { %1967 = vmatmul.msk.f32.vlgmr.msrb.gmra.mxu0 %vm75_vm6, %v2579_v29 }
 0xb7a   :  { %v1044_v32 = vsel %vm1043_vm11, %v2139_v18, %v1040_v31 }
 0xb7b   :  { %v1046_v33 = vmul.f32 %v1044_v32, %v1012_v0 }
 0xb7d   :  { %v1049_v35 = vmul.f32 %v2074_v21, %v1046_v33 }
 0xb7f   :  { %v2583_v39 = vadd.f32 %v2075_v25, %v1049_v35 }
 0xb81   :  { %1968 = vmatmul.msk.f32.gmra.mxu0 %vm75_vm6, %v2583_v39 }
 0xbf6   :  { %v1082_v34 = vpop.f32.mrf.mxu0 }
 0xbf7   :  { %v1083_v40 = vadd.f32 %v2076_v54, %v1082_v34 }
 0xbf9   :  { %1090 = vrot.lane.b32.xlu1 %v1083_v40, %s2214_s7 }
 0xbfe   :  { %v1085_v41 = vpop.f32.mrf.mxu0 }
 0xbff   :  { %v1086_v62 = vadd.f32 %v2076_v54, %v1085_v41 }
 0xc01   :  { %1092 = vrot.lane.b32.xlu0 %v1086_v62, %s2214_s7  ;;  %v2600_v38 = vpack.i.bf16 %v1083_v40, %v1086_v62 }
 0xc6b   :  { %v1091_v42 = vpop.permute.xlu1 %1090 }
 0xc73   :  { %v1093_v43 = vpop.permute.xlu0 %1092 }
 0xc74   :  { %1969 = vmatpush.xpose.msk.msrb.mxu1 %vm25_vm0, %v1093_v43 }
 0xc78   :  { %1970 = vmatpush.xpose.msk.msrb.mxu1 %vm25_vm0, %v1091_v42 }
 0xc7b   :  { %1971 = vmatmul.msk.f32.vlgmr.msrb.gmra.mxu1 %vm25_vm0, %v1083_v40 }
 0xc83   :  { %1972 = vmatmul.msk.f32.gmra.mxu1 %vm25_vm0, %v1086_v62 }
 0xcf8   :  { %v1119_v44 = vpop.f32.mrf.mxu1 }
 0xcf9   :  { %v1125_v46 = vmul.f32 0.35355338, %v1119_v44 }
 0xcfb   :  { %v1127_v30 = vadd.f32 %v1125_v46, %v2385_v53 }
 0xcfd   :  { %v1129_v47 = vsel %vm163_vm1, %v1127_v30, -inf }
 0xcfe   :  { %1130 = vmax.xlane.f32.xlu2 %v1129_v47 }
 0xd00   :  { %v1122_v28 = vpop.f32.mrf.mxu1 }
 0xd01   :  { %v1126_v36 = vmul.f32 0.35355338, %v1122_v28 }
 0xd03   :  { %v1128_v48 = vadd.f32 %v1126_v36, %v2389_v58 }
 0xd05   :  { %v1132_v37 = vsel %vm163_vm1, %v1128_v48, -inf }
 0xd06   :  { %1133 = vmax.xlane.f32.xlu2 %v1132_v37 }
 0xd1e   :  { %2043 = vrot.lane.b32.xlu2 %v2600_v38, %s2215_s2 }
 0xd26   :  { %1193 = vrot.lane.b32.xlu2 %v1086_v62, %s2216_s10 }
 0xd2e   :  { %1191 = vrot.lane.b32.xlu2 %v1083_v40, %s2216_s10 }
 0xd36   :  { %1187 = vrot.lane.b32.xlu2 %v1083_v40, %s2217_s11 }
 0xd3e   :  { %1352 = vrot.lane.b32.xlu2 %v1086_v62, %s2220_s14 }
 0xd46   :  { %1482 = vrot.lane.b32.xlu2 %v1083_v40, %s2218_s12 }
 0xd4e   :  { %1350 = vrot.lane.b32.xlu2 %v1083_v40, %s2220_s14 }
 0xd56   :  { %1348 = vrot.lane.b32.xlu2 %v1086_v62, %s2221_s15 }
 0xd71   :  { %v1131_v49 = vpop.xlane.xlu2 %1130 }
 0xd72   :  { %v1135_v50 = vsub.f32 %v1127_v30, %v1131_v49 }
 0xd74   :  { %v1137_v51 = vmul.f32 1.442695, %v1135_v50 }
 0xd76   :  { %2140 = vpow2.f32 %v1137_v51 }
 0xd79   :  { %v1134_v55 = vpop.xlane.xlu2 %1133 }
 0xd7a   :  { %v1136_v56 = vsub.f32 %v1128_v48, %v1134_v55 }
 0xd7c   :  { %v2141_v57 = vpop.eup %2140  ;;  %v1139_v60 = vmul.f32 1.442695, %v1136_v56 }
 0xd7d   :  { %v1141_v61 = vsel %vm163_vm1, %v2141_v57, 0.0 }
 0xd7e   :  { %2142 = vpow2.f32 %v1139_v60  ;;  %1142 = vadd.xlane.f32.xlu0 %v1141_v61 }
 0xd81   :  { %v2044_v63 = vpop.permute.xlu2 %2043 }
 0xd82   :  { %v2045_v0 = vunpack.i.l.bf16 %v2044_v63  ;;  %v2046_v2 = vunpack.i.h.bf16 %v2044_v63 }
 0xd84   :  { %v2143_v1 = vpop.eup %2142  ;;  %1177 = vmatpush.msrb.mxu2 %v2045_v0 }
 0xd85   :  { %v1144_v3 = vsel %vm163_vm1, %v2143_v1, 0.0 }
 0xd86   :  { %1145 = vadd.xlane.f32.xlu1 %v1144_v3  ;;  %1178 = vmatpush.msrb.mxu2 %v2046_v2 }
 0xd88   :  { %1338 = vmatpush.msra.mxu2 %v1186_v10 }
 0xd89   :  { %v1194_v4 = vpop.permute.xlu2 %1193 }
 0xd8a   :  { %1975 = vmatpush.xpose.msk.msrb.mxu3 %vm25_vm0, %v1194_v4 }
 0xd91   :  { %v1192_v5 = vpop.permute.xlu2 %1191 }
 0xd92   :  { %1484 = vrot.lane.b32.xlu0 %v1086_v62, %s2218_s12  ;;  %1976 = vmatpush.xpose.msk.msrb.mxu3 %vm25_vm0, %v1192_v5 }
 0xd99   :  { %v1188_v6 = vpop.permute.xlu2 %1187 }
 0xd9a   :  { %1478 = vrot.lane.b32.xlu0 %v1083_v40, %s2219_s13  ;;  %1977 = vmatmul.msk.f32.vlgmr.msrb.gmra.mxu3 %vm25_vm0, %v1188_v6 }
 0xd9f   :  { %1189 = vrot.lane.b32.xlu1 %v1086_v62, %s2217_s11 }
 0xda1   :  { %v1353_v7 = vpop.permute.xlu2 %1352 }
 0xda2   :  { %1346 = vrot.lane.b32.xlu0 %v1083_v40, %s2221_s15  ;;  %1985 = vmatpush.xpose.msk.msra.mxu3 %vm25_vm0, %v1353_v7 }
 0xda7   :  { %1480 = vrot.lane.b32.xlu1 %v1086_v62, %s2219_s13 }
 0xda9   :  { %v1483_v8 = vpop.permute.xlu2 %1482 }
 0xdb1   :  { %v1351_v9 = vpop.permute.xlu2 %1350 }
 0xdb2   :  { %1986 = vmatpush.xpose.msk.msra.mxu3 %vm25_vm0, %v1351_v9 }
 0xdb9   :  { %v1349_v24 = vpop.permute.xlu2 %1348 }
 0xdf1   :  { %v1143_v11 = vpop.xlane.xlu0 %1142 }
 0xdf2   :  { %2144 = vrcp.f32 %v1143_v11 }
 0xdf8   :  { %v2145_v12 = vpop.eup %2144 }
 0xdf9   :  { %v1149_v13 = vmul.f32 %v2145_v12, %v2141_v57  ;;  %v1146_v14 = vpop.xlane.xlu1 %1145 }
 0xdfa   :  { %2146 = vrcp.f32 %v1146_v14 }
 0xdfb   :  { %1973 = vmatmul.msk.f32.vlgmr.msrb.gmra.mxu2 %vm163_vm1, %v1149_v13 }
 0xe00   :  { %v2147_v15 = vpop.eup %2146 }
 0xe01   :  { %v1150_v16 = vmul.f32 %v2147_v15, %v2143_v1 }
 0xe03   :  { %1974 = vmatmul.msk.f32.gmra.mxu2 %vm163_vm1, %v1150_v16 }
 0xe04   :  { %v1485_v17 = vpop.permute.xlu0 %1484 }
 0xe05   :  { %1993 = vmatpush.xpose.msk.msrb.mxu2 %vm25_vm0, %v1485_v17 }
 0xe09   :  { %1994 = vmatpush.xpose.msk.msrb.mxu2 %vm25_vm0, %v1483_v8 }
 0xe0c   :  { %v1479_v18 = vpop.permute.xlu0 %1478 }
 0xe11   :  { %v1190_v19 = vpop.permute.xlu1 %1189 }
 0xe12   :  { %1978 = vmatmul.msk.f32.gmra.mxu3 %vm25_vm0, %v1190_v19 }
 0xe14   :  { %v1347_v20 = vpop.permute.xlu0 %1346 }
 0xe19   :  { %v1481_v31 = vpop.permute.xlu1 %1480 }
 0xe1a   :  { %1987 = vmatmul.msk.f32.vlgmr.msra.gmra.mxu3 %vm25_vm0, %v1347_v20 }
 0xe1d   :  { %v1220_v21 = vpop.f32.mrf.mxu3 }
 0xe1e   :  { %v1226_v22 = vmul.f32 0.35355338, %v1220_v21 }
 0xe20   :  { %v1228_v23 = vadd.f32 %v1226_v22, %v2385_v53 }
 0xe22   :  { %1988 = vmatmul.msk.f32.gmra.mxu3 %vm25_vm0, %v1349_v24  ;;  %v1230_v25 = vsel %vm163_vm1, %v1228_v23, -inf }
 0xe23   :  { %1231 = vmax.xlane.f32.xlu0 %v1230_v25 }
 0xe7e   :  { %v1180_v26 = vpop.f32.mrf.mxu2 }
 0xe7f   :  { %1983 = vmatmul.msk.f32.vlgmr.msra.gmra.mxu2 %vm25_vm0, %v1180_v26 }
 0xe86   :  { %v1183_v27 = vpop.f32.mrf.mxu2 }
 0xe87   :  { %1984 = vmatmul.msk.f32.gmra.mxu2 %vm25_vm0, %v1183_v27 }
 0xe8f   :  { %1995 = vmatmul.msk.f32.vlgmr.msrb.gmra.mxu2 %vm25_vm0, %v1479_v18 }
 0xe95   :  { %v1223_v52 = vpop.f32.mrf.mxu3 }
 0xe96   :  { %v1227_v32 = vmul.f32 0.35355338, %v1223_v52  ;;  %v1232_v33 = vpop.xlane.xlu0 %1231 }
 0xe97   :  { %1996 = vmatmul.msk.f32.gmra.mxu2 %vm25_vm0, %v1481_v31  ;;  %v1236_v54 = vsub.f32 %v1228_v23, %v1232_v33 }
 0xe98   :  { %v1229_v35 = vadd.f32 %v1227_v32, %v2389_v58 }
 0xe99   :  { %v1238_v40 = vmul.f32 1.442695, %v1236_v54 }
 0xe9a   :  { %v1233_v34 = vsel %vm163_vm1, %v1229_v35, -inf }
 0xe9b   :  { %1234 = vmax.xlane.f32.xlu1 %v1233_v34  ;;  %2148 = vpow2.f32 %v1238_v40 }
 0xe9d   :  { %v1379_v41 = vpop.f32.mrf.mxu3 }
 0xe9e   :  { %v1385_v62 = vmul.f32 0.35355338, %v1379_v41 }
 0xea0   :  { %v1387_v43 = vadd.f32 %v1385_v62, %v2385_v53 }
 0xea1   :  { %v2643_v30 = vpop.eup %2148 }
 0xea2   :  { %v1389_v42 = vsel %vm163_vm1, %v1387_v43, -inf  ;;  %v1242_v28 = vsel %vm163_vm1, %v2643_v30, 0.0 }
 0xea3   :  { %1390 = vmax.xlane.f32.xlu0 %v1389_v42 }
 0xea5   :  { %v1382_v44 = vpop.f32.mrf.mxu3 }
 0xea6   :  { %v1386_v46 = vmul.f32 0.35355338, %v1382_v44 }
 0xea8   :  { %v1388_v47 = vadd.f32 %v1386_v46, %v2389_v58 }
 0xeaa   :  { %v1392_v36 = vsel %vm163_vm1, %v1388_v47, -inf }
 0xeab   :  { %1243 = vadd.xlane.f32.xlu0 %v1242_v28  ;;  %1393 = vmax.xlane.f32.xlu2 %v1392_v36 }
 0xf02   :  { %v2649_v48 = vpop.f32.mrf.mxu2 }
 0xf0a   :  { %v2651_v37 = vpop.f32.mrf.mxu2 }
 0xf0e   :  { %v1235_v49 = vpop.xlane.xlu1 %1234 }
 0xf0f   :  { %v1237_v50 = vsub.f32 %v1229_v35, %v1235_v49  ;;  %v1287_v35 = vld [vmem:[%s2812_s4 + $0x180] sm:$0xff] }
 0xf10   :  { %1309 = vmatpush.msra.mxu1 %v1287_v35 }
 0xf11   :  { %v1240_v51 = vmul.f32 1.442695, %v1237_v50 }
 0xf12   :  { %v1511_v55 = vpop.f32.mrf.mxu2 }
 0xf13   :  { %v1517_v56 = vmul.f32 0.35355338, %v1511_v55  ;;  %2150 = vpow2.f32 %v1240_v51 }
 0xf15   :  { %v1519_v57 = vadd.f32 %v1517_v56, %v2385_v53 }
 0xf16   :  { %v1391_v60 = vpop.xlane.xlu0 %1390 }
 0xf17   :  { %v1395_v61 = vsub.f32 %v1387_v43, %v1391_v60  ;;  %v1521_v63 = vsel %vm163_vm1, %v1519_v57, -inf  ;;  %v1578_v60 = vld [vmem:[%s2812_s4 + $0x190] sm:$0xff] }
 0xf18   :  { %1522 = vmax.xlane.f32.xlu2 %v1521_v63 }
 0xf19   :  { %v1397_v0 = vmul.f32 1.442695, %v1395_v61  ;;  %v2151_v3 = vpop.eup %2150 }
 0xf1a   :  { %v1514_v1 = vpop.f32.mrf.mxu2  ;;  %v1245_v5 = vsel %vm163_vm1, %v2151_v3, 0.0 }
 0xf1b   :  { %v1518_v2 = vmul.f32 0.35355338, %v1514_v1  ;;  %2152 = vpow2.f32 %v1397_v0 }
 0xf1d   :  { %v1520_v4 = vadd.f32 %v1518_v2, %v2389_v58 }
 0xf1e   :  { %v1394_v8 = vpop.xlane.xlu2 %1393  ;;  %v1244_v22 = vpop.xlane.xlu0 %1243 }
 0xf1f   :  { %v1524_v6 = vsel %vm163_vm1, %v1520_v4, -inf  ;;  %v1396_v9 = vsub.f32 %v1388_v47, %v1394_v8 }
 0xf20   :  { %1246 = vadd.xlane.f32.xlu2 %v1245_v5  ;;  %1525 = vmax.xlane.f32.xlu1 %v1524_v6 }
 0xf21   :  { %v2153_v53 = vpop.eup %2152  ;;  %v1399_v10 = vmul.f32 1.442695, %v1396_v9 }
 0xf22   :  { %v1401_v7 = vsel %vm163_vm1, %v2153_v53, 0.0 }
 0xf23   :  { %2154 = vpow2.f32 %v1399_v10 }
 0xf28   :  { %1402 = vadd.xlane.f32.xlu2 %v1401_v7 }
 0xf29   :  { %v2155_v11 = vpop.eup %2154 }
 0xf2a   :  { %v1404_v58 = vsel %vm163_vm1, %v2155_v11, 0.0 }
 0xf39   :  { %2048 = vrot.lane.b32.xlu1 %v2600_v38, %s2222_s17 }
 0xf63   :  { %1405 = vadd.xlane.f32.xlu1 %v1404_v58 }
 0xf8b   :  { %v1523_v12 = vpop.xlane.xlu2 %1522 }
 0xf8c   :  { %v1527_v13 = vsub.f32 %v1519_v57, %v1523_v12  ;;  %v1446_v57 = vld [vmem:[%s2812_s4 + $0x188] sm:$0xff] }
 0xf8d   :  { %1468 = vmatpush.msrb.mxu1 %v1446_v57 }
 0xf8e   :  { %v1529_v14 = vmul.f32 1.442695, %v1527_v13 }
 0xf90   :  { %2156 = vpow2.f32 %v1529_v14 }
 0xf93   :  { %v1526_v15 = vpop.xlane.xlu1 %1525  ;;  %v1247_v23 = vpop.xlane.xlu2 %1246 }
 0xf94   :  { %v1528_v16 = vsub.f32 %v1520_v4, %v1526_v15 }
 0xf96   :  { %v2157_v17 = vpop.eup %2156  ;;  %v1531_v18 = vmul.f32 1.442695, %v1528_v16 }
 0xf97   :  { %v1533_v19 = vsel %vm163_vm1, %v2157_v17, 0.0 }
 0xf98   :  { %2158 = vpow2.f32 %v1531_v18  ;;  %1534 = vadd.xlane.f32.xlu0 %v1533_v19 }
 0xf99   :  { %2160 = vrcp.f32 %v1244_v22 }
 0xf9a   :  { %2162 = vrcp.f32 %v1247_v23 }
 0xf9b   :  { %v1403_v33 = vpop.xlane.xlu2 %1402 }
 0xf9c   :  { %2164 = vrcp.f32 %v1403_v33 }
 0xf9e   :  { %v2159_v20 = vpop.eup %2158 }
 0xf9f   :  { %v1536_v21 = vsel %vm163_vm1, %v2159_v20, 0.0  ;;  %v2161_v25 = vpop.eup %2160 }
 0xfa0   :  { %1537 = vadd.xlane.f32.xlu2 %v1536_v21  ;;  %v1250_v52 = vmul.f32 %v2161_v25, %v2643_v30  ;;  %v2163_v31 = vpop.eup %2162 }
 0xfa1   :  { %v1251_v32 = vmul.f32 %v2163_v31, %v2151_v3 }
 0xfa2   :  { %v2165_v62 = vpop.eup %2164 }
 0xfa3   :  { %v1409_v46 = vmul.f32 %v2165_v62, %v2153_v53  ;;  %v2077_v53 = vld [vmem:[%s2811_s3 + $0x10] ss:$0 sm:$0xff] }
 0xfab   :  { %v2049_v24 = vpop.permute.xlu1 %2048 }
 0xfac   :  { %v2050_v26 = vunpack.i.l.bf16 %v2049_v24  ;;  %2053 = vrot.lane.b32.xlu0 %v2600_v38, %s2223_s18  ;;  %v2051_v27 = vunpack.i.h.bf16 %v2049_v24 }
 0xfae   :  { %1278 = vmatpush.msra.mxu0 %v2050_v26  ;;  %v1670_v26 = vld [vmem:[%s2812_s4 + $0x1a8] sm:$0xff] }
 0xfb0   :  { %1279 = vmatpush.msra.mxu0 %v2051_v27  ;;  %v1669_v27 = vld [vmem:[%s2812_s4 + $0x1a0] sm:$0xff] }
 0xfb1   :  { %1979 = vmatmul.msk.f32.vlgmr.msra.gmra.mxu0 %vm163_vm1, %v1250_v52  ;;  %v1668_v52 = vld [vmem:[%s2812_s4 + $0x198] sm:$0xff] }
 0xfb8   :  { %2058 = vrot.lane.b32.xlu2 %v2600_v38, %s2224_s19  ;;  %s2225_s19 = smov [#allocation2]  }
 0xfb9   :  { %1980 = vmatmul.msk.f32.gmra.mxu0 %vm163_vm1, %v1251_v32  ;;  %s1904_s23 = sshll.u32 %s2225_s19, 4  ;;  %s1905_s23 = int_to_ptr.vmem [resolvable:$true] %s1904_s23 }
 0xfd6   :  { %v1406_v40 = vpop.xlane.xlu1 %1405 }
0x100b   :  { %v1535_v34 = vpop.xlane.xlu0 %1534 }
0x100c   :  { %2166 = vrcp.f32 %v1535_v34 }
0x100d   :  { %2168 = vrcp.f32 %v1406_v40 }
0x1012   :  { %v2167_v38 = vpop.eup %2166 }
0x1013   :  { %v1538_v54 = vpop.xlane.xlu2 %1537  ;;  %v1541_v28 = vmul.f32 %v2167_v38, %v2157_v17  ;;  %v2169_v36 = vpop.eup %2168 }
0x1014   :  { %2170 = vrcp.f32 %v1538_v54  ;;  %v1410_v50 = vmul.f32 %v2169_v36, %v2155_v11 }
0x101a   :  { %v2171_v49 = vpop.eup %2170 }
0x101b   :  { %v2059_v41 = vpop.permute.xlu2 %2058  ;;  %v1542_v51 = vmul.f32 %v2171_v49, %v2159_v20  ;;  %v2079_v49 = vld [vmem:[%s2811_s3 + $0x12] ss:$0 sm:$0xff] }
0x101c   :  { %v2060_v43 = vunpack.i.l.bf16 %v2059_v41  ;;  %v2061_v42 = vunpack.i.h.bf16 %v2059_v41 }
0x101e   :  { %v2054_v44 = vpop.permute.xlu0 %2053  ;;  %1437 = vmatpush.msrb.mxu0 %v2060_v43 }
0x101f   :  { %v2055_v30 = vunpack.i.l.bf16 %v2054_v44  ;;  %v2056_v47 = vunpack.i.h.bf16 %v2054_v44 }
0x1020   :  { %1438 = vmatpush.msrb.mxu0 %v2061_v42 }
0x1021   :  { %1989 = vmatmul.msk.f32.vlgmr.msrb.gmra.mxu0 %vm163_vm1, %v1409_v46  ;;  %1569 = vmatpush.msrb.mxu3 %v2055_v30  ;;  %v2078_v30 = vld [vmem:[%s2811_s3 + $0x11] ss:$0 sm:$0xff] }
0x1022   :  { %1600 = vmatpush.msra.mxu0 %v1578_v60 }
0x1023   :  { %1570 = vmatpush.msrb.mxu3 %v2056_v47 }
0x1024   :  { %1997 = vmatmul.msk.f32.vlgmr.msrb.gmra.mxu3 %vm163_vm1, %v1541_v28 }
0x1029   :  { %1990 = vmatmul.msk.f32.gmra.mxu0 %vm163_vm1, %v1410_v50 }
0x102c   :  { %1998 = vmatmul.msk.f32.gmra.mxu3 %vm163_vm1, %v1542_v51 }
0x102e   :  { %v1281_v55 = vpop.f32.mrf.mxu0 }
0x102f   :  { %1981 = vmatmul.msk.f32.vlgmr.msra.gmra.mxu1 %vm25_vm0, %v1281_v55 }
0x1036   :  { %v1284_v56 = vpop.f32.mrf.mxu0 }
0x1037   :  { %1982 = vmatmul.msk.f32.gmra.mxu1 %vm25_vm0, %v1284_v56 }
0x109e   :  { %v1440_v61 = vpop.f32.mrf.mxu0 }
0x109f   :  { %1991 = vmatmul.msk.f32.vlgmr.msrb.gmra.mxu1 %vm25_vm0, %v1440_v61 }
0x10a6   :  { %v1443_v63 = vpop.f32.mrf.mxu0 }
0x10a7   :  { %1992 = vmatmul.msk.f32.gmra.mxu1 %vm25_vm0, %v1443_v63  ;;  %v1572_v0 = vpop.f32.mrf.mxu3 }
0x10a8   :  { %1999 = vmatmul.msk.f32.vlgmr.msra.gmra.mxu0 %vm25_vm0, %v1572_v0 }
0x10ac   :  { %v1311_v2 = vpop.f32.mrf.mxu1 }
0x10ad   :  { %v1341_v5 = vadd.f32 %v2649_v48, %v1311_v2  ;;  %v1727_v2 = vld [vmem:[%s2812_s4 + $0x1e8] sm:$0xff] }
0x10af   :  { %v1575_v1 = vpop.f32.mrf.mxu3 }
0x10b0   :  { %2000 = vmatmul.msk.f32.gmra.mxu0 %vm25_vm0, %v1575_v1  ;;  %v1728_v1 = vld [vmem:[%s2812_s4 + $0x1f0] sm:$0xff] }
0x10b1   :  { %1745 = vmatpush.msra.mxu2 %v1728_v1 }
0x10b3   :  { %1746 = vmatpush.msra.mxu2 %v1727_v2 }
0x10b4   :  { %v1314_v3 = vpop.f32.mrf.mxu1 }
0x10b5   :  { %v1344_v11 = vadd.f32 %v2651_v37, %v1314_v3  ;;  %v1726_v3 = vld [vmem:[%s2812_s4 + $0x1e0] sm:$0xff] }
0x10b6   :  { %1747 = vmatpush.msra.mxu2 %v1726_v3 }
0x111c   :  { %v1470_v4 = vpop.f32.mrf.mxu1 }
0x111d   :  { %v1476_v6 = vadd.f32 %v1470_v4, %v1341_v5  ;;  %v1725_v4 = vld [vmem:[%s2812_s4 + $0x1d8] sm:$0xff]  ;;  %v1724_v5 = vld [vmem:[%s2812_s4 + $0x1d0] sm:$0xff] }
0x111e   :  { %1748 = vmatpush.msra.mxu2 %v1725_v4 }
0x1120   :  { %1749 = vmatpush.msra.mxu2 %v1724_v5 }
0x1124   :  { %v1473_v10 = vpop.f32.mrf.mxu1 }
0x1125   :  { %v1602_v7 = vpop.f32.mrf.mxu0  ;;  %v1477_v12 = vadd.f32 %v1473_v10, %v1344_v11 }
0x1126   :  { %v1608_v8 = vadd.f32 %v1602_v7, %v1476_v6  ;;  %v1723_v6 = vld [vmem:[%s2812_s4 + $0x1c8] sm:$0xff]  ;;  %v1721_v7 = vld [vmem:[%s2812_s4 + $0x1b8] sm:$0xff] }
0x1127   :  { %1750 = vmatpush.msra.mxu2 %v1723_v6 }
0x1128   :  { %v1612_v9 = vadd.f32 %v2077_v53, %v1608_v8  ;;  %v2080_v8 = vld [vmem:[%s2811_s3 + $0x13] ss:$0 sm:$0xff] }
0x112a   :  { %v1614_v58 = vadd.f32 %v1612_v9, %v2579_v29 }
0x112c   :  { %v1618_v13 = vsel %vm75_vm6, %v1614_v58, 0.0 }
0x112d   :  { %v1605_v14 = vpop.f32.mrf.mxu0  ;;  %1619 = vadd.xlane.f32.xlu0 %v1618_v13 }
0x112e   :  { %v1609_v15 = vadd.f32 %v1605_v14, %v1477_v12 }
0x1130   :  { %v1613_v48 = vadd.f32 %v2077_v53, %v1609_v15  ;;  %v1722_v53 = vld [vmem:[%s2812_s4 + $0x1c0] sm:$0xff] }
0x1131   :  { %1751 = vmatpush.msra.mxu2 %v1722_v53 }
0x1132   :  { %v1615_v16 = vadd.f32 %v1613_v48, %v2583_v39  ;;  %v1671_v39 = vld [vmem:[%s2812_s4 + $0x1b0] sm:$0xff] }
0x1133   :  { %1692 = vmatpush.msra.mxu1 %v1671_v39  ;;  %1752 = vmatpush.msra.mxu2 %v1721_v7 }
0x1134   :  { %v1621_v17 = vsel %vm75_vm6, %v1615_v16, 0.0 }
0x1135   :  { %1622 = vadd.xlane.f32.xlu2 %v1621_v17  ;;  %1693 = vmatpush.msra.mxu1 %v1670_v26  ;;  %v2081_v26 = vld [vmem:[%s2811_s3 + $0x14] ss:$0 sm:$0xff] }
0x1137   :  { %1694 = vmatpush.msra.mxu1 %v1669_v27 }
0x1139   :  { %1695 = vmatpush.msra.mxu1 %v1668_v52 }
0x11a0   :  { %v1620_v18 = vpop.xlane.xlu0 %1619 }
0x11a1   :  { %v1624_v19 = vmul.f32 %v1620_v18, %v2323_v59 }
0x11a3   :  { %v1626_v20 = vsub.f32 %v1614_v58, %v1624_v19 }
0x11a5   :  { %v1628_v21 = vmul.f32 %v1626_v20, %v1626_v20 }
0x11a7   :  { %v1630_v37 = vsel %vm75_vm6, %v1628_v21, 0.0 }
0x11a8   :  { %1631 = vadd.xlane.f32.xlu1 %v1630_v37  ;;  %v1623_v29 = vpop.xlane.xlu2 %1622 }
0x11a9   :  { %v1625_v22 = vmul.f32 %v1623_v29, %v2323_v59 }
0x11ab   :  { %v1627_v23 = vsub.f32 %v1615_v16, %v1625_v22 }
0x11ad   :  { %v1629_v24 = vmul.f32 %v1627_v23, %v1627_v23 }
0x11af   :  { %v1633_v25 = vsel %vm75_vm6, %v1629_v24, 0.0 }
0x11b0   :  { %1634 = vadd.xlane.f32.xlu1 %v1633_v25 }
0x121b   :  { %v1632_v31 = vpop.xlane.xlu1 %1631 }
0x121c   :  { %v1636_v32 = vmul.f32 %v1632_v31, %v2323_v59 }
0x121e   :  { %v1638_v33 = vadd.f32 1e-12, %v1636_v32 }
0x1220   :  { %2172 = vrsqrt.f32 %v1638_v33  ;;  %vm1646_vm14 = vweird.f32 %v1638_v33 }
0x1223   :  { %v1635_v35 = vpop.xlane.xlu1 %1634 }
0x1224   :  { %v1637_v54 = vmul.f32 %v1635_v35, %v2323_v59 }
0x1226   :  { %v2173_v34 = vpop.eup %2172  ;;  %v1639_v40 = vadd.f32 1e-12, %v1637_v54 }
0x1227   :  { %v1641_v41 = vmul.f32 %v2173_v34, %v1638_v33  ;;  %vm1647_vm0 = vweird.f32 %v2173_v34 }
0x1228   :  { %2174 = vrsqrt.f32 %v1639_v40  ;;  %vm1648_vm15 = vmor %vm1646_vm14, %vm1647_vm0  ;;  %vm1656_vm3 = vweird.f32 %v1639_v40 }
0x1229   :  { %v1642_v62 = vmul.f32 %v2173_v34, %v1641_v41 }
0x122b   :  { %v1643_v43 = vmul.f32 0.5, %v1642_v62 }
0x122d   :  { %v1644_v42 = vsub.f32 1.5, %v1643_v43 }
0x122e   :  { %v2175_v44 = vpop.eup %2174 }
0x122f   :  { %v1645_v38 = vmul.f32 %v2173_v34, %v1644_v42  ;;  %v1651_v46 = vmul.f32 %v2175_v44, %v1639_v40  ;;  %vm1657_vm2 = vweird.f32 %v2175_v44 }
0x1230   :  { %vm1658_vm4 = vmor %vm1656_vm3, %vm1657_vm2 }
0x1231   :  { %v1649_v47 = vsel %vm1648_vm15, %v2173_v34, %v1645_v38  ;;  %v1652_v28 = vmul.f32 %v2175_v44, %v1651_v46 }
0x1232   :  { %v1660_v36 = vmul.f32 %v1649_v47, %v1626_v20 }
0x1233   :  { %v1653_v50 = vmul.f32 0.5, %v1652_v28 }
0x1234   :  { %v1663_v51 = vmul.f32 %v2078_v30, %v1660_v36 }
0x1235   :  { %v1654_v55 = vsub.f32 1.5, %v1653_v50 }
0x1236   :  { %v1666_v56 = vadd.f32 %v2079_v49, %v1663_v51  ;;  %v1841_v51 = vld [vmem:[%s2812_s4 + $0x50] sm:$0xff] }
0x1237   :  { %v1655_v57 = vmul.f32 %v2175_v44, %v1654_v55  ;;  %v1840_v55 = vld [vmem:[%s2812_s4 + $0x48] sm:$0xff]  ;;  %1859 = vmatpush.msrb.mxu0 %v1841_v51 }
0x1238   :  { %2001 = vmatmul.msk.f32.vlgmr.msra.gmra.mxu1 %vm75_vm6, %v1666_v56 }
0x1239   :  { %v1659_v60 = vsel %vm1658_vm4, %v2175_v44, %v1655_v57  ;;  %v1839_v57 = vld [vmem:[%s2812_s4 + $0x40] sm:$0xff]  ;;  %1860 = vmatpush.msrb.mxu0 %v1840_v55 }
0x123a   :  { %v1661_v61 = vmul.f32 %v1659_v60, %v1627_v23 }
0x123b   :  { %1861 = vmatpush.msrb.mxu0 %v1839_v57 }
0x123c   :  { %v1664_v63 = vmul.f32 %v2078_v30, %v1661_v61 }
0x123e   :  { %v1667_v0 = vadd.f32 %v2079_v49, %v1664_v63 }
0x1240   :  { %2002 = vmatmul.msk.f32.gmra.mxu1 %vm75_vm6, %v1667_v0 }
0x12b5   :  { %v1697_v9 = vpop.f32.mrf.mxu1 }
0x12b6   :  { %v1698_v10 = vadd.f32 %v2080_v8, %v1697_v9 }
0x12b8   :  { %v1705_v11 = vmul.f32 0.044715, %v1698_v10  ;;  %v1703_v37 = vmul.f32 0.5, %v1698_v10 }
0x12ba   :  { %v1707_v58 = vmul.f32 %v1705_v11, %v1698_v10 }
0x12bc   :  { %v1709_v12 = vmul.f32 %v1707_v58, %v1698_v10 }
0x12bd   :  { %v1700_v13 = vpop.f32.mrf.mxu1 }
0x12be   :  { %v1711_v14 = vadd.f32 %v1709_v12, %v1698_v10  ;;  %v1701_v15 = vadd.f32 %v2080_v8, %v1700_v13  ;;  %v2082_v10 = vld [vmem:[%s2811_s3 + $0x15] ss:$0 sm:$0xff] }
0x12c0   :  { %v1713_v48 = vmul.f32 0.7978846, %v1711_v14  ;;  %v1706_v16 = vmul.f32 0.044715, %v1701_v15  ;;  %v1704_v24 = vmul.f32 0.5, %v1701_v15 }
0x12c1   :  { %v2083_v14 = vld [vmem:[%s2811_s3 + $0x16] ss:$0 sm:$0xff] }
0x12c2   :  { %2176 = vtanh.f32 %v1713_v48  ;;  %v1708_v17 = vmul.f32 %v1706_v16, %v1701_v15  ;;  %v1814_v16 = vmul.f32 0.125, %v2361_v45  ;;  %v1869_v45 = vld [vmem:[%s2812_s4 + $0x60] sm:$0xff] }
0x12c4   :  { %v1710_v18 = vmul.f32 %v1708_v17, %v1701_v15 }
0x12c6   :  { %v1712_v19 = vadd.f32 %v1710_v18, %v1701_v15 }
0x12c8   :  { %v2177_v20 = vpop.eup %2176  ;;  %v1714_v21 = vmul.f32 0.7978846, %v1712_v19  ;;  %v1871_v19 = vld [vmem:[%s2812_s4 + $0x70] sm:$0xff] }
0x12c9   :  { %v1717_v29 = vadd.f32 1.0, %v2177_v20  ;;  %v1870_v20 = vld [vmem:[%s2812_s4 + $0x68] sm:$0xff] }
0x12ca   :  { %2178 = vtanh.f32 %v1714_v21  ;;  %v1868_v21 = vld [vmem:[%s2812_s4 + $0x58] sm:$0xff] }
0x12cb   :  { %v1719_v22 = vmul.f32 %v1717_v29, %v1703_v37  ;;  %v2084_v37 = vld [vmem:[%s2811_s3 + $0x5] ss:$0 sm:$0xff] }
0x12cd   :  { %2003 = vmatmul.msk.f32.vlgmr.msra.gmra.mxu2 %vm969_vm7, %v1719_v22 }
0x12d0   :  { %v2179_v23 = vpop.eup %2178 }
0x12d1   :  { %v1718_v25 = vadd.f32 1.0, %v2179_v23 }
0x12d3   :  { %v1720_v39 = vmul.f32 %v1718_v25, %v1704_v24  ;;  %v2085_v24 = vld [vmem:[%s2811_s3 + $0x6] ss:$0 sm:$0xff] }
0x12d5   :  { %2004 = vmatmul.msk.f32.gmra.mxu2 %vm969_vm7, %v1720_v39 }
0x1350   :  { %v1754_v27 = vpop.f32.mrf.mxu2 }
0x1351   :  { %v1755_v52 = vadd.f32 %v2081_v26, %v1754_v27 }
0x1353   :  { %v1760_v31 = vadd.f32 %v1755_v52, %v1666_v56 }
0x1355   :  { %v1764_v32 = vsel %vm75_vm6, %v1760_v31, 0.0 }
0x1356   :  { %1765 = vadd.xlane.f32.xlu1 %v1764_v32 }
0x1358   :  { %v1757_v33 = vpop.f32.mrf.mxu2 }
0x1359   :  { %v1758_v35 = vadd.f32 %v2081_v26, %v1757_v33 }
0x135b   :  { %v1761_v54 = vadd.f32 %v1758_v35, %v1667_v0  ;;  %v1838_v0 = vld [vmem:[%s2812_s4 + $0x38] sm:$0xff] }
0x135c   :  { %1862 = vmatpush.msrb.mxu0 %v1838_v0 }
0x135d   :  { %v1767_v34 = vsel %vm75_vm6, %v1761_v54, 0.0 }
0x135e   :  { %1768 = vadd.xlane.f32.xlu0 %v1767_v34 }
0x13c9   :  { %v1766_v40 = vpop.xlane.xlu1 %1765 }
0x13ca   :  { %v1770_v41 = vmul.f32 %v1766_v40, %v2323_v59 }
0x13cc   :  { %v1772_v62 = vsub.f32 %v1760_v31, %v1770_v41 }
0x13ce   :  { %v1774_v43 = vmul.f32 %v1772_v62, %v1772_v62 }
0x13d0   :  { %v1776_v42 = vsel %vm75_vm6, %v1774_v43, 0.0 }
0x13d1   :  { %v1769_v44 = vpop.xlane.xlu0 %1768  ;;  %1777 = vadd.xlane.f32.xlu2 %v1776_v42 }
0x13d2   :  { %v1771_v38 = vmul.f32 %v1769_v44, %v2323_v59 }
0x13d4   :  { %v1773_v46 = vsub.f32 %v1761_v54, %v1771_v38 }
0x13d6   :  { %v1775_v30 = vmul.f32 %v1773_v46, %v1773_v46 }
0x13d8   :  { %v1779_v47 = vsel %vm75_vm6, %v1775_v30, 0.0 }
0x13d9   :  { %1780 = vadd.xlane.f32.xlu0 %v1779_v47 }
0x1444   :  { %v1778_v28 = vpop.xlane.xlu2 %1777 }
0x1445   :  { %v1782_v36 = vmul.f32 %v1778_v28, %v2323_v59 }
0x1447   :  { %v1784_v49 = vadd.f32 1e-12, %v1782_v36 }
0x1449   :  { %2180 = vrsqrt.f32 %v1784_v49  ;;  %vm1792_vm7 = vweird.f32 %v1784_v49 }
0x144c   :  { %v1781_v50 = vpop.xlane.xlu0 %1780 }
0x144d   :  { %v1783_v56 = vmul.f32 %v1781_v50, %v2323_v59 }
0x144f   :  { %v2181_v60 = vpop.eup %2180  ;;  %v1785_v61 = vadd.f32 1e-12, %v1783_v56 }
0x1450   :  { %v1787_v63 = vmul.f32 %v2181_v60, %v1784_v49  ;;  %vm1793_vm5 = vweird.f32 %v2181_v60 }
0x1451   :  { %2182 = vrsqrt.f32 %v1785_v61  ;;  %vm1794_vm8 = vmor %vm1792_vm7, %vm1793_vm5  ;;  %vm1802_vm12 = vweird.f32 %v1785_v61 }
0x1452   :  { %v1788_v1 = vmul.f32 %v2181_v60, %v1787_v63 }
0x1454   :  { %v1789_v2 = vmul.f32 0.5, %v1788_v1 }
0x1456   :  { %v1790_v3 = vsub.f32 1.5, %v1789_v2 }
0x1457   :  { %v2183_v59 = vpop.eup %2182 }
0x1458   :  { %v1797_v4 = vmul.f32 %v2183_v59, %v1785_v61  ;;  %v1791_v5 = vmul.f32 %v2181_v60, %v1790_v3  ;;  %vm1803_vm9 = vweird.f32 %v2183_v59 }
0x1459   :  { %vm1804_vm13 = vmor %vm1802_vm12, %vm1803_vm9 }
0x145a   :  { %v1798_v6 = vmul.f32 %v2183_v59, %v1797_v4  ;;  %v1795_v7 = vsel %vm1794_vm8, %v2181_v60, %v1791_v5 }
0x145b   :  { %v1806_v11 = vmul.f32 %v1795_v7, %v1772_v62 }
0x145c   :  { %v1799_v53 = vmul.f32 0.5, %v1798_v6 }
0x145d   :  { %v1809_v15 = vmul.f32 %v2082_v10, %v1806_v11 }
0x145e   :  { %v1800_v8 = vsub.f32 1.5, %v1799_v53 }
0x145f   :  { %v1812_v17 = vadd.f32 %v2083_v14, %v1809_v15 }
0x1460   :  { %v1801_v9 = vmul.f32 %v2183_v59, %v1800_v8 }
0x1462   :  { %v1805_v58 = vsel %vm1804_vm13, %v2183_v59, %v1801_v9 }
0x1463   :  { %v1807_v12 = vmul.f32 %v1805_v58, %v1773_v46 }
0x1465   :  { %v1810_v13 = vmul.f32 %v2082_v10, %v1807_v12 }
0x1467   :  { %v1813_v48 = vadd.f32 %v2083_v14, %v1810_v13 }
0x1469   :  { %1832 = vmatpush.msra.mxu3 %v1813_v48 }
0x146b   :  { %1833 = vmatpush.msra.mxu3 %v1812_v17 }
0x146c   :  { %2005 = vmatmul.msk.f32.vlgmr.msra.gmra.mxu3 %vm163_vm1, %v1814_v16  ;;  %vm1897_vm1 = vcmask 17408  }
0x146d   :  { %1889 = vmatpush.msrb.mxu3 %v1871_v19 }
0x146f   :  { %1890 = vmatpush.msrb.mxu3 %v1870_v20 }
0x1471   :  { %1891 = vmatpush.msrb.mxu3 %v1869_v45 }
0x1473   :  { %1892 = vmatpush.msrb.mxu3 %v1868_v21 }
0x14ef   :  { %v1835_v18 = vpop.f32.mrf.mxu3 }
0x14f0   :  { %2006 = vmatmul.msk.f32.vlgmr.msrb.gmra.mxu0 %vm75_vm6, %v1835_v18 }
0x156d   :  { %v1864_v29 = vpop.f32.mrf.mxu0 }
0x156e   :  { %v1865_v22 = vadd.f32 %v2084_v37, %v1864_v29 }
0x1570   :  { %2184 = vtanh.f32 %v1865_v22 }
0x1576   :  { %v2185_v23 = vpop.eup %2184 }
0x1577   :  { %2007 = vmatmul.msk.f32.vlgmr.msrb.gmra.mxu3 %vm75_vm6, %v2185_v23 }
0x15fa   :  { %v1894_v25 = vpop.f32.mrf.mxu3 }
0x15fb   :  { %v1895_v39 = vadd.f32 %v2085_v24, %v1894_v25 }
0x15fd   :  { %1898 = vst.msk [vmem:[#allocation2] sm:$0x3] %vm1897_vm1, %v1895_v39 }
0x15fe   :  { %1909 = dma.vmem_to_hbm [thread:$0]  %s1905_s23, 32, %s1907_s25, [#allocation3]  }
0x15ff   :  { %2210 = dma.done.wait [#allocation3], 32  }
0x1600   :  { %2211 = vsyncadd [#allocation3], 4294967264 }
0x1601   :  { %1914 = vsyncpa [#allocation3], 1 }

</bundles_post_ra>
